<compile_context>
chip_gen: v5e
topology: v5e:2x2
jax: 0.10.0
libtpu: 0.0.40
codegen_flags: <defaults>
</compile_context>

<pallas_src>
import functools

import jax
import jax.numpy as jnp
from jax import lax
from jax.experimental import pallas as pl
from jax.experimental.pallas import tpu as pltpu


def _resblock_kernel(x_ref, w1_ref, b1_ref, w2_ref, b2_ref, o_ref, mid_ref, *,
                     res_scale, H, W, K, CP, HP, WP, M0):
    """One batch image per grid step.

    x_ref   : (CP, TOT)     channel-major, zero-padded, lane-flattened image
                            (TOT = M0 + HP*WP + M0; data in cols [M0, M0+NPIX))
    w*_ref  : (K*K, CP, CP) per-tap weight matrices, w[t, co, ci]
    b*_ref  : (CP, 1)       per-output-channel biases (zero-padded rows)
    o_ref   : (CP, NPIX)    lane-dense output slab (padding pixels hold junk,
                            discarded by the wrapper unpack)
    mid_ref : (CP, TOT)     scratch: relu(conv1) with exact zero ring/margins
    """
    P = K // 2
    NPIX = HP * WP
    TOT = NPIX + 2 * M0
    WSHIFT = WP.bit_length() - 1

    # ---- conv1: 9 per-tap MXU GEMMs, f32 accumulation -----------------------
    acc1 = jnp.zeros((CP, NPIX), jnp.float32)
    for kh in range(K):
        for kw in range(K):
            t = kh * K + kw
            off = M0 + (kh - P) * WP + (kw - P)
            xs = x_ref[:, off:off + NPIX]                       # (CP, NPIX)
            acc1 = acc1 + jnp.dot(w1_ref[t], xs,
                                  preferred_element_type=jnp.float32)

    # Zero the padding ring of relu(conv1) so conv2's SAME padding is exact.
    col = lax.broadcasted_iota(jnp.int32, (CP, NPIX), 1)
    wl = col & (WP - 1)
    hl = col >> WSHIFT
    keep = (hl >= P) & (hl < P + H) & (wl >= P) & (wl < P + W)
    mid = jnp.where(keep, jnp.maximum(acc1 + b1_ref[...], 0.0), 0.0)

    # Zero ONLY the two lane margins (aligned (CP, M0) tiles), then one
    # aligned, unmasked interior store.
    mid_ref[:, 0:M0] = jnp.zeros((CP, M0), jnp.float32)
    mid_ref[:, M0 + NPIX:TOT] = jnp.zeros((CP, M0), jnp.float32)
    mid_ref[:, M0:M0 + NPIX] = mid

    # ---- conv2 (+bias) and the scaled residual add ---------------------------
    acc2 = jnp.zeros((CP, NPIX), jnp.float32)
    for kh in range(K):
        for kw in range(K):
            t = kh * K + kw
            off = M0 + (kh - P) * WP + (kw - P)
            ms = mid_ref[:, off:off + NPIX]                     # (CP, NPIX)
            acc2 = acc2 + jnp.dot(w2_ref[t], ms,
                                  preferred_element_type=jnp.float32)

    res = acc2 + b2_ref[...]
    xc = x_ref[:, M0:M0 + NPIX].astype(jnp.float32)             # residual term
    o_ref[...] = (xc + jnp.float32(res_scale) * res).astype(o_ref.dtype)


def _pack_tap_weights(w, CP):
    """HWIO (K,K,Cin,Cout) -> (K*K, CP, CP) with wt[t, co, ci] = w[kh,kw,ci,co]."""
    K, _, C, _ = w.shape
    wt = jnp.transpose(w.astype(jnp.float32).reshape(K * K, C, C), (0, 2, 1))
    return jnp.zeros((K * K, CP, CP), jnp.float32).at[:, :C, :C].set(wt)


@functools.partial(jax.jit, static_argnames=("res_scale",))
def resblock_pallas(x, w1, b1, w2, b2, res_scale=1.0):
    """x: (N, C, H, W) f32; w*: (K, K, Cin, Cout) HWIO; b*: (C,)."""
    N, C, H, W = x.shape
    K = w1.shape[0]
    P = K // 2
    CP = ((C + 7) // 8) * 8                       # channels padded to sublane mult
    WP = pl.next_power_of_2(W + 2 * P)            # per-row lane pitch (pow2 -> mask via bit ops)
    align = max(1, 128 // WP)
    HP = ((H + 2 * P + align - 1) // align) * align
    NPIX = HP * WP                                # pixels per image (multiple of 128)
    M0 = ((WP + P + 127) // 128) * 128            # 128-aligned lane margin for tap shifts
    TOT = NPIX + 2 * M0
    assert WP & (WP - 1) == 0 and WP >= W + 2 * P
    assert NPIX % 128 == 0 and M0 >= WP + P

    # --- layout plumbing only (no compute hoisted): channel-major, zero-padded,
    #     lane-flattened input -> one dense DMA per image.
    xp = jnp.zeros((N, CP, HP, WP), x.dtype).at[:, :C, P:P + H, P:P + W].set(x)
    xin = jnp.pad(xp.reshape(N, CP, NPIX), ((0, 0), (0, 0), (M0, M0)))

    wk1 = _pack_tap_weights(w1, CP)
    wk2 = _pack_tap_weights(w2, CP)
    bv1 = jnp.zeros((CP, 1), jnp.float32).at[:C, 0].set(b1.astype(jnp.float32))
    bv2 = jnp.zeros((CP, 1), jnp.float32).at[:C, 0].set(b2.astype(jnp.float32))

    kernel = functools.partial(_resblock_kernel, res_scale=float(res_scale),
                               H=H, W=W, K=K, CP=CP, HP=HP, WP=WP, M0=M0)

    slab = pl.pallas_call(
        kernel,
        out_shape=jax.ShapeDtypeStruct((N, CP, NPIX), x.dtype),
        grid_spec=pltpu.PrefetchScalarGridSpec(
            num_scalar_prefetch=0,
            grid=(N,),                                   # one image per step
            in_specs=[
                pl.BlockSpec((None, CP, TOT), lambda n: (n, 0, 0)),
                pl.BlockSpec((K * K, CP, CP), lambda n: (0, 0, 0)),
                pl.BlockSpec((CP, 1), lambda n: (0, 0)),
                pl.BlockSpec((K * K, CP, CP), lambda n: (0, 0, 0)),
                pl.BlockSpec((CP, 1), lambda n: (0, 0)),
            ],
            out_specs=pl.BlockSpec((None, CP, NPIX), lambda n: (n, 0, 0)),
            scratch_shapes=[pltpu.VMEM((CP, TOT), jnp.float32)],  # relu(conv1)
        ),
        compiler_params=pltpu.CompilerParams(
            dimension_semantics=("parallel",)),          # both TCs on v7x
    )(xin, wk1, bv1, wk2, bv2)

    # Layout plumbing: slice the valid pixels back out; already NCHW ordered.
    return slab.reshape(N, CP, HP, WP)[:, :C, P:P + H, P:P + W]


def resblock_reference(x, w1, b1, w2, b2, res_scale):
    """Pure-JAX reference matching torch: conv3x3(same) -> ReLU -> conv3x3(same)."""
    dn = ('NCHW', 'HWIO', 'NCHW')
    y = lax.conv_general_dilated(x, w1, (1, 1), 'SAME', dimension_numbers=dn)
    y = y + b1.reshape(1, -1, 1, 1)
    y = jnp.maximum(y, 0.0)
    y = lax.conv_general_dilated(y, w2, (1, 1), 'SAME', dimension_numbers=dn)
    y = y + b2.reshape(1, -1, 1, 1)
    return x + res_scale * y


if __name__ == "__main__":
    key = jax.random.PRNGKey(0)
    kx, kw1, kb1, kw2, kb2 = jax.random.split(key, 5)

    # Shapes implied by ResBlock(conv, n_feats, kernel_size=3): two 3x3 convs
    # with n_feats -> n_feats channels, bias=True, bn=False, act=ReLU.
    N, C, H, W = 2, 4, 16, 16
    K = 3
    res_scale = 0.1

    x = jax.random.normal(kx, (N, C, H, W), dtype=jnp.float32)

    # Deterministic synthetic parameters (PyTorch-Conv2d-like uniform init),
    # stored as (kh, kw, in, out) = HWIO.
    fan_in = C * K * K
    bound = 1.0 / (fan_in ** 0.5)
    w1 = jax.random.uniform(kw1, (K, K, C, C), jnp.float32, -bound, bound)
    b1 = jax.random.uniform(kb1, (C,), jnp.float32, -bound, bound)
    w2 = jax.random.uniform(kw2, (K, K, C, C), jnp.float32, -bound, bound)
    b2 = jax.random.uniform(kb2, (C,), jnp.float32, -bound, bound)

    out = resblock_pallas(x, w1, b1, w2, b2, res_scale=res_scale)
    out = jax.block_until_ready(out)

    ref = resblock_reference(x, w1, b1, w2, b2, res_scale)
    assert out.shape == (N, C, H, W), out.shape
    if not jnp.allclose(out, ref, atol=1e-4, rtol=1e-4):
        raise AssertionError("Pallas ResBlock does not match reference")
    print("KERNEL_OK")
</pallas_src>

<mosaic_0001>
module attributes {stable_mosaic.version = 11 : i64} {
  func.func @_resblock_kernel(%arg0: i32, %arg1: memref<1x8x896xf32, #tpu.memory_space<vmem>>, %arg2: memref<9x8x8xf32, #tpu.memory_space<vmem>>, %arg3: memref<8x1xf32, #tpu.memory_space<vmem>>, %arg4: memref<9x8x8xf32, #tpu.memory_space<vmem>>, %arg5: memref<8x1xf32, #tpu.memory_space<vmem>>, %arg6: memref<1x8x640xf32, #tpu.memory_space<vmem>>, %arg7: memref<8x896xf32, #tpu.memory_space<vmem>>) attributes {dimension_semantics = [#tpu.dimension_semantics<parallel>], iteration_bounds = array<i64: 2>, scalar_prefetch = 0 : i64, scratch_operands = 1 : i64, tpu.core_type = #tpu.core_type<tc>, window_params = [{transform_indices = @transform_0, window_bounds = array<i64: 1, 8, 896>}, {pipeline_mode = #tpu.pipeline_mode<synchronous>, transform_indices = @transform_1, window_bounds = array<i64: 9, 8, 8>}, {pipeline_mode = #tpu.pipeline_mode<synchronous>, transform_indices = @transform_2, window_bounds = array<i64: 8, 1>}, {pipeline_mode = #tpu.pipeline_mode<synchronous>, transform_indices = @transform_3, window_bounds = array<i64: 9, 8, 8>}, {pipeline_mode = #tpu.pipeline_mode<synchronous>, transform_indices = @transform_4, window_bounds = array<i64: 8, 1>}, {transform_indices = @transform_5, window_bounds = array<i64: 1, 8, 640>}]} {
    %cst = arith.constant 0.000000e+00 : f32
    %0 = vector.broadcast %cst : f32 to vector<8x640xf32>
    %c0 = arith.constant 0 : index
    %c0_0 = arith.constant 0 : index
    %c95 = arith.constant 95 : index
    %1 = vector.load %arg1[%c0, %c0_0, %c95] : memref<1x8x896xf32, #tpu.memory_space<vmem>>, vector<1x8x640xf32>
    %2 = vector.shape_cast %1 : vector<1x8x640xf32> to vector<8x640xf32>
    %c0_1 = arith.constant 0 : index
    %c0_2 = arith.constant 0 : index
    %c0_3 = arith.constant 0 : index
    %3 = vector.load %arg2[%c0_1, %c0_2, %c0_3] : memref<9x8x8xf32, #tpu.memory_space<vmem>>, vector<1x8x8xf32>
    %4 = vector.shape_cast %3 : vector<1x8x8xf32> to vector<8x8xf32>
    %cst_4 = arith.constant dense<0.000000e+00> : vector<8x640xf32>
    %5 = tpu.matmul %4, %2, %cst_4 {dimension_numbers = #tpu.dot_dimension_numbers<[1], [0], [0], [1], [0, 0, 1, 1], [], []>} : vector<8x8xf32>, vector<8x640xf32>, vector<8x640xf32> -> vector<8x640xf32>
    %6 = arith.addf %0, %5 : vector<8x640xf32>
    %c0_5 = arith.constant 0 : index
    %c0_6 = arith.constant 0 : index
    %c96 = arith.constant 96 : index
    %7 = vector.load %arg1[%c0_5, %c0_6, %c96] : memref<1x8x896xf32, #tpu.memory_space<vmem>>, vector<1x8x640xf32>
    %8 = vector.shape_cast %7 : vector<1x8x640xf32> to vector<8x640xf32>
    %c1 = arith.constant 1 : index
    %c0_7 = arith.constant 0 : index
    %c0_8 = arith.constant 0 : index
    %9 = vector.load %arg2[%c1, %c0_7, %c0_8] : memref<9x8x8xf32, #tpu.memory_space<vmem>>, vector<1x8x8xf32>
    %10 = vector.shape_cast %9 : vector<1x8x8xf32> to vector<8x8xf32>
    %cst_9 = arith.constant dense<0.000000e+00> : vector<8x640xf32>
    %11 = tpu.matmul %10, %8, %cst_9 {dimension_numbers = #tpu.dot_dimension_numbers<[1], [0], [0], [1], [0, 0, 1, 1], [], []>} : vector<8x8xf32>, vector<8x640xf32>, vector<8x640xf32> -> vector<8x640xf32>
    %12 = arith.addf %6, %11 : vector<8x640xf32>
    %c0_10 = arith.constant 0 : index
    %c0_11 = arith.constant 0 : index
    %c97 = arith.constant 97 : index
    %13 = vector.load %arg1[%c0_10, %c0_11, %c97] : memref<1x8x896xf32, #tpu.memory_space<vmem>>, vector<1x8x640xf32>
    %14 = vector.shape_cast %13 : vector<1x8x640xf32> to vector<8x640xf32>
    %c2 = arith.constant 2 : index
    %c0_12 = arith.constant 0 : index
    %c0_13 = arith.constant 0 : index
    %15 = vector.load %arg2[%c2, %c0_12, %c0_13] : memref<9x8x8xf32, #tpu.memory_space<vmem>>, vector<1x8x8xf32>
    %16 = vector.shape_cast %15 : vector<1x8x8xf32> to vector<8x8xf32>
    %cst_14 = arith.constant dense<0.000000e+00> : vector<8x640xf32>
    %17 = tpu.matmul %16, %14, %cst_14 {dimension_numbers = #tpu.dot_dimension_numbers<[1], [0], [0], [1], [0, 0, 1, 1], [], []>} : vector<8x8xf32>, vector<8x640xf32>, vector<8x640xf32> -> vector<8x640xf32>
    %18 = arith.addf %12, %17 : vector<8x640xf32>
    %c0_15 = arith.constant 0 : index
    %c0_16 = arith.constant 0 : index
    %c127 = arith.constant 127 : index
    %19 = vector.load %arg1[%c0_15, %c0_16, %c127] : memref<1x8x896xf32, #tpu.memory_space<vmem>>, vector<1x8x640xf32>
    %20 = vector.shape_cast %19 : vector<1x8x640xf32> to vector<8x640xf32>
    %c3 = arith.constant 3 : index
    %c0_17 = arith.constant 0 : index
    %c0_18 = arith.constant 0 : index
    %21 = vector.load %arg2[%c3, %c0_17, %c0_18] : memref<9x8x8xf32, #tpu.memory_space<vmem>>, vector<1x8x8xf32>
    %22 = vector.shape_cast %21 : vector<1x8x8xf32> to vector<8x8xf32>
    %cst_19 = arith.constant dense<0.000000e+00> : vector<8x640xf32>
    %23 = tpu.matmul %22, %20, %cst_19 {dimension_numbers = #tpu.dot_dimension_numbers<[1], [0], [0], [1], [0, 0, 1, 1], [], []>} : vector<8x8xf32>, vector<8x640xf32>, vector<8x640xf32> -> vector<8x640xf32>
    %24 = arith.addf %18, %23 : vector<8x640xf32>
    %c0_20 = arith.constant 0 : index
    %c0_21 = arith.constant 0 : index
    %c128 = arith.constant 128 : index
    %25 = vector.load %arg1[%c0_20, %c0_21, %c128] : memref<1x8x896xf32, #tpu.memory_space<vmem>>, vector<1x8x640xf32>
    %26 = vector.shape_cast %25 : vector<1x8x640xf32> to vector<8x640xf32>
    %c4 = arith.constant 4 : index
    %c0_22 = arith.constant 0 : index
    %c0_23 = arith.constant 0 : index
    %27 = vector.load %arg2[%c4, %c0_22, %c0_23] : memref<9x8x8xf32, #tpu.memory_space<vmem>>, vector<1x8x8xf32>
    %28 = vector.shape_cast %27 : vector<1x8x8xf32> to vector<8x8xf32>
    %cst_24 = arith.constant dense<0.000000e+00> : vector<8x640xf32>
    %29 = tpu.matmul %28, %26, %cst_24 {dimension_numbers = #tpu.dot_dimension_numbers<[1], [0], [0], [1], [0, 0, 1, 1], [], []>} : vector<8x8xf32>, vector<8x640xf32>, vector<8x640xf32> -> vector<8x640xf32>
    %30 = arith.addf %24, %29 : vector<8x640xf32>
    %c0_25 = arith.constant 0 : index
    %c0_26 = arith.constant 0 : index
    %c129 = arith.constant 129 : index
    %31 = vector.load %arg1[%c0_25, %c0_26, %c129] : memref<1x8x896xf32, #tpu.memory_space<vmem>>, vector<1x8x640xf32>
    %32 = vector.shape_cast %31 : vector<1x8x640xf32> to vector<8x640xf32>
    %c5 = arith.constant 5 : index
    %c0_27 = arith.constant 0 : index
    %c0_28 = arith.constant 0 : index
    %33 = vector.load %arg2[%c5, %c0_27, %c0_28] : memref<9x8x8xf32, #tpu.memory_space<vmem>>, vector<1x8x8xf32>
    %34 = vector.shape_cast %33 : vector<1x8x8xf32> to vector<8x8xf32>
    %cst_29 = arith.constant dense<0.000000e+00> : vector<8x640xf32>
    %35 = tpu.matmul %34, %32, %cst_29 {dimension_numbers = #tpu.dot_dimension_numbers<[1], [0], [0], [1], [0, 0, 1, 1], [], []>} : vector<8x8xf32>, vector<8x640xf32>, vector<8x640xf32> -> vector<8x640xf32>
    %36 = arith.addf %30, %35 : vector<8x640xf32>
    %c0_30 = arith.constant 0 : index
    %c0_31 = arith.constant 0 : index
    %c159 = arith.constant 159 : index
    %37 = vector.load %arg1[%c0_30, %c0_31, %c159] : memref<1x8x896xf32, #tpu.memory_space<vmem>>, vector<1x8x640xf32>
    %38 = vector.shape_cast %37 : vector<1x8x640xf32> to vector<8x640xf32>
    %c6 = arith.constant 6 : index
    %c0_32 = arith.constant 0 : index
    %c0_33 = arith.constant 0 : index
    %39 = vector.load %arg2[%c6, %c0_32, %c0_33] : memref<9x8x8xf32, #tpu.memory_space<vmem>>, vector<1x8x8xf32>
    %40 = vector.shape_cast %39 : vector<1x8x8xf32> to vector<8x8xf32>
    %cst_34 = arith.constant dense<0.000000e+00> : vector<8x640xf32>
    %41 = tpu.matmul %40, %38, %cst_34 {dimension_numbers = #tpu.dot_dimension_numbers<[1], [0], [0], [1], [0, 0, 1, 1], [], []>} : vector<8x8xf32>, vector<8x640xf32>, vector<8x640xf32> -> vector<8x640xf32>
    %42 = arith.addf %36, %41 : vector<8x640xf32>
    %c0_35 = arith.constant 0 : index
    %c0_36 = arith.constant 0 : index
    %c160 = arith.constant 160 : index
    %43 = vector.load %arg1[%c0_35, %c0_36, %c160] : memref<1x8x896xf32, #tpu.memory_space<vmem>>, vector<1x8x640xf32>
    %44 = vector.shape_cast %43 : vector<1x8x640xf32> to vector<8x640xf32>
    %c7 = arith.constant 7 : index
    %c0_37 = arith.constant 0 : index
    %c0_38 = arith.constant 0 : index
    %45 = vector.load %arg2[%c7, %c0_37, %c0_38] : memref<9x8x8xf32, #tpu.memory_space<vmem>>, vector<1x8x8xf32>
    %46 = vector.shape_cast %45 : vector<1x8x8xf32> to vector<8x8xf32>
    %cst_39 = arith.constant dense<0.000000e+00> : vector<8x640xf32>
    %47 = tpu.matmul %46, %44, %cst_39 {dimension_numbers = #tpu.dot_dimension_numbers<[1], [0], [0], [1], [0, 0, 1, 1], [], []>} : vector<8x8xf32>, vector<8x640xf32>, vector<8x640xf32> -> vector<8x640xf32>
    %48 = arith.addf %42, %47 : vector<8x640xf32>
    %c0_40 = arith.constant 0 : index
    %c0_41 = arith.constant 0 : index
    %c161 = arith.constant 161 : index
    %49 = vector.load %arg1[%c0_40, %c0_41, %c161] : memref<1x8x896xf32, #tpu.memory_space<vmem>>, vector<1x8x640xf32>
    %50 = vector.shape_cast %49 : vector<1x8x640xf32> to vector<8x640xf32>
    %c8 = arith.constant 8 : index
    %c0_42 = arith.constant 0 : index
    %c0_43 = arith.constant 0 : index
    %51 = vector.load %arg2[%c8, %c0_42, %c0_43] : memref<9x8x8xf32, #tpu.memory_space<vmem>>, vector<1x8x8xf32>
    %52 = vector.shape_cast %51 : vector<1x8x8xf32> to vector<8x8xf32>
    %cst_44 = arith.constant dense<0.000000e+00> : vector<8x640xf32>
    %53 = tpu.matmul %52, %50, %cst_44 {dimension_numbers = #tpu.dot_dimension_numbers<[1], [0], [0], [1], [0, 0, 1, 1], [], []>} : vector<8x8xf32>, vector<8x640xf32>, vector<8x640xf32> -> vector<8x640xf32>
    %54 = arith.addf %48, %53 : vector<8x640xf32>
    %55 = tpu.iota {dimensions = array<i32: 1>} : vector<8x640xi32>
    %c31_i32 = arith.constant 31 : i32
    %56 = vector.broadcast %c31_i32 : i32 to vector<8x640xi32>
    %57 = arith.andi %55, %56 : vector<8x640xi32>
    %c5_i32 = arith.constant 5 : i32
    %58 = vector.broadcast %c5_i32 : i32 to vector<8x640xi32>
    %59 = arith.shrsi %55, %58 : vector<8x640xi32>
    %c1_i32 = arith.constant 1 : i32
    %60 = vector.broadcast %c1_i32 : i32 to vector<8x640xi32>
    %61 = arith.cmpi sge, %59, %60 : vector<8x640xi32>
    %c17_i32 = arith.constant 17 : i32
    %62 = vector.broadcast %c17_i32 : i32 to vector<8x640xi32>
    %63 = arith.cmpi slt, %59, %62 : vector<8x640xi32>
    %64 = arith.andi %61, %63 : vector<8x640xi1>
    %c1_i32_45 = arith.constant 1 : i32
    %65 = vector.broadcast %c1_i32_45 : i32 to vector<8x640xi32>
    %66 = arith.cmpi sge, %57, %65 : vector<8x640xi32>
    %67 = arith.andi %64, %66 : vector<8x640xi1>
    %c17_i32_46 = arith.constant 17 : i32
    %68 = vector.broadcast %c17_i32_46 : i32 to vector<8x640xi32>
    %69 = arith.cmpi slt, %57, %68 : vector<8x640xi32>
    %70 = arith.andi %67, %69 : vector<8x640xi1>
    %c0_47 = arith.constant 0 : index
    %c0_48 = arith.constant 0 : index
    %71 = vector.load %arg3[%c0_47, %c0_48] : memref<8x1xf32, #tpu.memory_space<vmem>>, vector<8x1xf32>
    %72 = vector.broadcast %71 : vector<8x1xf32> to vector<8x640xf32>
    %73 = arith.addf %54, %72 : vector<8x640xf32>
    %cst_49 = arith.constant 0.000000e+00 : f32
    %74 = vector.broadcast %cst_49 : f32 to vector<8x640xf32>
    %75 = arith.maximumf %73, %74 : vector<8x640xf32>
    %cst_50 = arith.constant 0.000000e+00 : f32
    %76 = vector.broadcast %cst_50 : f32 to vector<8x640xf32>
    %77 = arith.select %70, %75, %76 : vector<8x640xi1>, vector<8x640xf32>
    %cst_51 = arith.constant 0.000000e+00 : f32
    %78 = vector.broadcast %cst_51 : f32 to vector<8x128xf32>
    %c0_52 = arith.constant 0 : index
    %c0_53 = arith.constant 0 : index
    %79 = vector.load %arg7[%c0_52, %c0_53] : memref<8x896xf32, #tpu.memory_space<vmem>>, vector<8x128xf32>
    tpu.vector_store %arg7[%c0_52, %c0_53], %78 {strides = array<i32>} : memref<8x896xf32, #tpu.memory_space<vmem>>, vector<8x128xf32>,
    %cst_54 = arith.constant 0.000000e+00 : f32
    %80 = vector.broadcast %cst_54 : f32 to vector<8x128xf32>
    %c0_55 = arith.constant 0 : index
    %c768 = arith.constant 768 : index
    %81 = vector.load %arg7[%c0_55, %c768] : memref<8x896xf32, #tpu.memory_space<vmem>>, vector<8x128xf32>
    tpu.vector_store %arg7[%c0_55, %c768], %80 {strides = array<i32>} : memref<8x896xf32, #tpu.memory_space<vmem>>, vector<8x128xf32>,
    %c0_56 = arith.constant 0 : index
    %c128_57 = arith.constant 128 : index
    %82 = vector.load %arg7[%c0_56, %c128_57] : memref<8x896xf32, #tpu.memory_space<vmem>>, vector<8x640xf32>
    tpu.vector_store %arg7[%c0_56, %c128_57], %77 {strides = array<i32>} : memref<8x896xf32, #tpu.memory_space<vmem>>, vector<8x640xf32>,
    %cst_58 = arith.constant 0.000000e+00 : f32
    %83 = vector.broadcast %cst_58 : f32 to vector<8x640xf32>
    %c0_59 = arith.constant 0 : index
    %c95_60 = arith.constant 95 : index
    %84 = vector.load %arg7[%c0_59, %c95_60] : memref<8x896xf32, #tpu.memory_space<vmem>>, vector<8x640xf32>
    %c0_61 = arith.constant 0 : index
    %c0_62 = arith.constant 0 : index
    %c0_63 = arith.constant 0 : index
    %85 = vector.load %arg4[%c0_61, %c0_62, %c0_63] : memref<9x8x8xf32, #tpu.memory_space<vmem>>, vector<1x8x8xf32>
    %86 = vector.shape_cast %85 : vector<1x8x8xf32> to vector<8x8xf32>
    %cst_64 = arith.constant dense<0.000000e+00> : vector<8x640xf32>
    %87 = tpu.matmul %86, %84, %cst_64 {dimension_numbers = #tpu.dot_dimension_numbers<[1], [0], [0], [1], [0, 0, 1, 1], [], []>} : vector<8x8xf32>, vector<8x640xf32>, vector<8x640xf32> -> vector<8x640xf32>
    %88 = arith.addf %83, %87 : vector<8x640xf32>
    %c0_65 = arith.constant 0 : index
    %c96_66 = arith.constant 96 : index
    %89 = vector.load %arg7[%c0_65, %c96_66] : memref<8x896xf32, #tpu.memory_space<vmem>>, vector<8x640xf32>
    %c1_67 = arith.constant 1 : index
    %c0_68 = arith.constant 0 : index
    %c0_69 = arith.constant 0 : index
    %90 = vector.load %arg4[%c1_67, %c0_68, %c0_69] : memref<9x8x8xf32, #tpu.memory_space<vmem>>, vector<1x8x8xf32>
    %91 = vector.shape_cast %90 : vector<1x8x8xf32> to vector<8x8xf32>
    %cst_70 = arith.constant dense<0.000000e+00> : vector<8x640xf32>
    %92 = tpu.matmul %91, %89, %cst_70 {dimension_numbers = #tpu.dot_dimension_numbers<[1], [0], [0], [1], [0, 0, 1, 1], [], []>} : vector<8x8xf32>, vector<8x640xf32>, vector<8x640xf32> -> vector<8x640xf32>
    %93 = arith.addf %88, %92 : vector<8x640xf32>
    %c0_71 = arith.constant 0 : index
    %c97_72 = arith.constant 97 : index
    %94 = vector.load %arg7[%c0_71, %c97_72] : memref<8x896xf32, #tpu.memory_space<vmem>>, vector<8x640xf32>
    %c2_73 = arith.constant 2 : index
    %c0_74 = arith.constant 0 : index
    %c0_75 = arith.constant 0 : index
    %95 = vector.load %arg4[%c2_73, %c0_74, %c0_75] : memref<9x8x8xf32, #tpu.memory_space<vmem>>, vector<1x8x8xf32>
    %96 = vector.shape_cast %95 : vector<1x8x8xf32> to vector<8x8xf32>
    %cst_76 = arith.constant dense<0.000000e+00> : vector<8x640xf32>
    %97 = tpu.matmul %96, %94, %cst_76 {dimension_numbers = #tpu.dot_dimension_numbers<[1], [0], [0], [1], [0, 0, 1, 1], [], []>} : vector<8x8xf32>, vector<8x640xf32>, vector<8x640xf32> -> vector<8x640xf32>
    %98 = arith.addf %93, %97 : vector<8x640xf32>
    %c0_77 = arith.constant 0 : index
    %c127_78 = arith.constant 127 : index
    %99 = vector.load %arg7[%c0_77, %c127_78] : memref<8x896xf32, #tpu.memory_space<vmem>>, vector<8x640xf32>
    %c3_79 = arith.constant 3 : index
    %c0_80 = arith.constant 0 : index
    %c0_81 = arith.constant 0 : index
    %100 = vector.load %arg4[%c3_79, %c0_80, %c0_81] : memref<9x8x8xf32, #tpu.memory_space<vmem>>, vector<1x8x8xf32>
    %101 = vector.shape_cast %100 : vector<1x8x8xf32> to vector<8x8xf32>
    %cst_82 = arith.constant dense<0.000000e+00> : vector<8x640xf32>
    %102 = tpu.matmul %101, %99, %cst_82 {dimension_numbers = #tpu.dot_dimension_numbers<[1], [0], [0], [1], [0, 0, 1, 1], [], []>} : vector<8x8xf32>, vector<8x640xf32>, vector<8x640xf32> -> vector<8x640xf32>
    %103 = arith.addf %98, %102 : vector<8x640xf32>
    %c0_83 = arith.constant 0 : index
    %c128_84 = arith.constant 128 : index
    %104 = vector.load %arg7[%c0_83, %c128_84] : memref<8x896xf32, #tpu.memory_space<vmem>>, vector<8x640xf32>
    %c4_85 = arith.constant 4 : index
    %c0_86 = arith.constant 0 : index
    %c0_87 = arith.constant 0 : index
    %105 = vector.load %arg4[%c4_85, %c0_86, %c0_87] : memref<9x8x8xf32, #tpu.memory_space<vmem>>, vector<1x8x8xf32>
    %106 = vector.shape_cast %105 : vector<1x8x8xf32> to vector<8x8xf32>
    %cst_88 = arith.constant dense<0.000000e+00> : vector<8x640xf32>
    %107 = tpu.matmul %106, %104, %cst_88 {dimension_numbers = #tpu.dot_dimension_numbers<[1], [0], [0], [1], [0, 0, 1, 1], [], []>} : vector<8x8xf32>, vector<8x640xf32>, vector<8x640xf32> -> vector<8x640xf32>
    %108 = arith.addf %103, %107 : vector<8x640xf32>
    %c0_89 = arith.constant 0 : index
    %c129_90 = arith.constant 129 : index
    %109 = vector.load %arg7[%c0_89, %c129_90] : memref<8x896xf32, #tpu.memory_space<vmem>>, vector<8x640xf32>
    %c5_91 = arith.constant 5 : index
    %c0_92 = arith.constant 0 : index
    %c0_93 = arith.constant 0 : index
    %110 = vector.load %arg4[%c5_91, %c0_92, %c0_93] : memref<9x8x8xf32, #tpu.memory_space<vmem>>, vector<1x8x8xf32>
    %111 = vector.shape_cast %110 : vector<1x8x8xf32> to vector<8x8xf32>
    %cst_94 = arith.constant dense<0.000000e+00> : vector<8x640xf32>
    %112 = tpu.matmul %111, %109, %cst_94 {dimension_numbers = #tpu.dot_dimension_numbers<[1], [0], [0], [1], [0, 0, 1, 1], [], []>} : vector<8x8xf32>, vector<8x640xf32>, vector<8x640xf32> -> vector<8x640xf32>
    %113 = arith.addf %108, %112 : vector<8x640xf32>
    %c0_95 = arith.constant 0 : index
    %c159_96 = arith.constant 159 : index
    %114 = vector.load %arg7[%c0_95, %c159_96] : memref<8x896xf32, #tpu.memory_space<vmem>>, vector<8x640xf32>
    %c6_97 = arith.constant 6 : index
    %c0_98 = arith.constant 0 : index
    %c0_99 = arith.constant 0 : index
    %115 = vector.load %arg4[%c6_97, %c0_98, %c0_99] : memref<9x8x8xf32, #tpu.memory_space<vmem>>, vector<1x8x8xf32>
    %116 = vector.shape_cast %115 : vector<1x8x8xf32> to vector<8x8xf32>
    %cst_100 = arith.constant dense<0.000000e+00> : vector<8x640xf32>
    %117 = tpu.matmul %116, %114, %cst_100 {dimension_numbers = #tpu.dot_dimension_numbers<[1], [0], [0], [1], [0, 0, 1, 1], [], []>} : vector<8x8xf32>, vector<8x640xf32>, vector<8x640xf32> -> vector<8x640xf32>
    %118 = arith.addf %113, %117 : vector<8x640xf32>
    %c0_101 = arith.constant 0 : index
    %c160_102 = arith.constant 160 : index
    %119 = vector.load %arg7[%c0_101, %c160_102] : memref<8x896xf32, #tpu.memory_space<vmem>>, vector<8x640xf32>
    %c7_103 = arith.constant 7 : index
    %c0_104 = arith.constant 0 : index
    %c0_105 = arith.constant 0 : index
    %120 = vector.load %arg4[%c7_103, %c0_104, %c0_105] : memref<9x8x8xf32, #tpu.memory_space<vmem>>, vector<1x8x8xf32>
    %121 = vector.shape_cast %120 : vector<1x8x8xf32> to vector<8x8xf32>
    %cst_106 = arith.constant dense<0.000000e+00> : vector<8x640xf32>
    %122 = tpu.matmul %121, %119, %cst_106 {dimension_numbers = #tpu.dot_dimension_numbers<[1], [0], [0], [1], [0, 0, 1, 1], [], []>} : vector<8x8xf32>, vector<8x640xf32>, vector<8x640xf32> -> vector<8x640xf32>
    %123 = arith.addf %118, %122 : vector<8x640xf32>
    %c0_107 = arith.constant 0 : index
    %c161_108 = arith.constant 161 : index
    %124 = vector.load %arg7[%c0_107, %c161_108] : memref<8x896xf32, #tpu.memory_space<vmem>>, vector<8x640xf32>
    %c8_109 = arith.constant 8 : index
    %c0_110 = arith.constant 0 : index
    %c0_111 = arith.constant 0 : index
    %125 = vector.load %arg4[%c8_109, %c0_110, %c0_111] : memref<9x8x8xf32, #tpu.memory_space<vmem>>, vector<1x8x8xf32>
    %126 = vector.shape_cast %125 : vector<1x8x8xf32> to vector<8x8xf32>
    %cst_112 = arith.constant dense<0.000000e+00> : vector<8x640xf32>
    %127 = tpu.matmul %126, %124, %cst_112 {dimension_numbers = #tpu.dot_dimension_numbers<[1], [0], [0], [1], [0, 0, 1, 1], [], []>} : vector<8x8xf32>, vector<8x640xf32>, vector<8x640xf32> -> vector<8x640xf32>
    %128 = arith.addf %123, %127 : vector<8x640xf32>
    %c0_113 = arith.constant 0 : index
    %c0_114 = arith.constant 0 : index
    %129 = vector.load %arg5[%c0_113, %c0_114] : memref<8x1xf32, #tpu.memory_space<vmem>>, vector<8x1xf32>
    %130 = vector.broadcast %129 : vector<8x1xf32> to vector<8x640xf32>
    %131 = arith.addf %128, %130 : vector<8x640xf32>
    %c0_115 = arith.constant 0 : index
    %c0_116 = arith.constant 0 : index
    %c128_117 = arith.constant 128 : index
    %132 = vector.load %arg1[%c0_115, %c0_116, %c128_117] : memref<1x8x896xf32, #tpu.memory_space<vmem>>, vector<1x8x640xf32>
    %133 = vector.shape_cast %132 : vector<1x8x640xf32> to vector<8x640xf32>
    %cst_118 = arith.constant 1.000000e-01 : f32
    %134 = vector.broadcast %cst_118 : f32 to vector<8x640xf32>
    %135 = arith.mulf %134, %131 : vector<8x640xf32>
    %136 = arith.addf %133, %135 : vector<8x640xf32>
    %c0_119 = arith.constant 0 : index
    %c0_120 = arith.constant 0 : index
    %c0_121 = arith.constant 0 : index
    %137 = vector.load %arg6[%c0_119, %c0_120, %c0_121] : memref<1x8x640xf32, #tpu.memory_space<vmem>>, vector<1x8x640xf32>
    %138 = vector.shape_cast %137 : vector<1x8x640xf32> to vector<8x640xf32>
    %139 = vector.shape_cast %136 : vector<8x640xf32> to vector<1x8x640xf32>
    tpu.vector_store %arg6[%c0_119, %c0_120, %c0_121], %139 {strides = array<i32>} : memref<1x8x640xf32, #tpu.memory_space<vmem>>, vector<1x8x640xf32>,
    return
  }
  func.func @transform_0(%arg0: i32) -> (i32, i32, i32) {
    %c0_i32 = arith.constant 0 : i32
    %c0_i32_0 = arith.constant 0 : i32
    %c0_i32_1 = arith.constant 0 : i32
    return %arg0, %c0_i32, %c0_i32_0 : i32, i32, i32
  }
  func.func @transform_1(%arg0: i32) -> (i32, i32, i32) {
    %c0_i32 = arith.constant 0 : i32
    %c0_i32_0 = arith.constant 0 : i32
    %c0_i32_1 = arith.constant 0 : i32
    %c0_i32_2 = arith.constant 0 : i32
    return %c0_i32, %c0_i32_0, %c0_i32_1 : i32, i32, i32
  }
  func.func @transform_2(%arg0: i32) -> (i32, i32) {
    %c0_i32 = arith.constant 0 : i32
    %c0_i32_0 = arith.constant 0 : i32
    %c0_i32_1 = arith.constant 0 : i32
    return %c0_i32, %c0_i32_0 : i32, i32
  }
  func.func @transform_3(%arg0: i32) -> (i32, i32, i32) {
    %c0_i32 = arith.constant 0 : i32
    %c0_i32_0 = arith.constant 0 : i32
    %c0_i32_1 = arith.constant 0 : i32
    %c0_i32_2 = arith.constant 0 : i32
    return %c0_i32, %c0_i32_0, %c0_i32_1 : i32, i32, i32
  }
  func.func @transform_4(%arg0: i32) -> (i32, i32) {
    %c0_i32 = arith.constant 0 : i32
    %c0_i32_0 = arith.constant 0 : i32
    %c0_i32_1 = arith.constant 0 : i32
    return %c0_i32, %c0_i32_0 : i32, i32
  }
  func.func @transform_5(%arg0: i32) -> (i32, i32, i32) {
    %c0_i32 = arith.constant 0 : i32
    %c0_i32_0 = arith.constant 0 : i32
    %c0_i32_1 = arith.constant 0 : i32
    return %arg0, %c0_i32, %c0_i32_0 : i32, i32, i32
  }
}

</mosaic_0001>

<bundles_post_ra>
// kernel: resblock_pallas.1
= control target key start
LH: loop header
LB: loop body
LE: loop exit
PB: predicated region body
PF: predicated region fallthrough
CT: control target
= control target key end

     0   :  { %s3183_s18 = smov 0   ;;  %s3822_s0 = inlined_call_operand.vmem [shape: f32[2,8,896], index: 0, kind: input, shape index: {}]   ;;  %s3823_s1 = inlined_call_operand.vmem [shape: f32[9,8,8], index: 1, kind: input, shape index: {}]   ;;  %s3824_s2 = inlined_call_operand.vmem [shape: f32[8,1], index: 2, kind: input, shape index: {}]   ;;  %s3825_s3 = inlined_call_operand.vmem [shape: f32[9,8,8], index: 3, kind: input, shape index: {}]   ;;  %s3826_s4 = inlined_call_operand.vmem [shape: f32[8,1], index: 4, kind: input, shape index: {}]   ;;  %s3827_s5 = inlined_call_operand.vmem [shape: f32[2,8,640], index: 5, kind: output, shape index: {}]  }
   0x1 LB: > { %s2757_s19 = sadd.s32 4294967295, %s3141_s18   ;;  %p2761_p0 = scmp.ge.s32.totalorder %s3141_s18, 1  ;;  %s3141_s18 = sphi %s3183_s18, %s15_s18  }
   0x2   : > { %p187_p1 = scmp.lt.s32.totalorder %s3141_s18, 3 }
   0x4   : > { %p188_p2 = pnand %p2761_p0, %p187_p1 }
   0x5   : > { %p215_p3 = scmp.lt.s32.totalorder (!%p188_p2), %s2757_s19, 1  ;;  %s3143_s24 = smov (!%p188_p2), 32  }
   0x6   : > { %191 = sbr.rel (%p188_p2) target bundleno = 706 (0x2c2), region = 40  ;;  %s3144_s25 = smov (!%p188_p2), 33  }
   0x7   : > { %s3145_s26 = smov (!%p188_p2), 31   ;;  %s3146_s27 = smov (!%p188_p2), 1  }
   0x8   : > { %s3147_s28 = smov (!%p188_p2), 127   ;;  %s3148_s29 = smov (!%p188_p2), 97  }
   0x9   : > { %s3149_s30 = smov (!%p188_p2), 96   ;;  %s3150_s6 = smov (!%p188_p2), 95  }
   0xb   : > { %s3979_s19 = smov (!%p215_p3, %s2757_s19), 1  ;;  %vm3836_vm0 = vcmask 261120   ;;  %v2764_v28 = vld [vmem:[%s3823_s1 + $0x8] sm:$0xff]  ;;  %vm3835_vm1 = vcmask 64512   ;;  %vm3834_vm2 = vcmask 269312   ;;  %vm3833_vm3 = vcmask 252928  }
   0xc   : > { %s2877_s20 = smul.u32 56, %s3979_s19  ;;  %v231_v47 = vld [vmem:[%s3823_s1] sm:$0xff]  ;;  %v2775_v62 = vld [vmem:[%s3823_s1 + $0x10] sm:$0xff]  ;;  %vm3832_vm4 = vcmask 7168   ;;  %vm3831_vm5 = vcmask 1039360   ;;  %vm3830_vm6 = vcmask 793600  }
   0xd   : > { %vm3829_vm7 = vcmask 785408   ;;  %vm3828_vm8 = vcmask 777216   ;;  %s2878_s11 = smul.u32 40, %s3979_s19 }
   0xe   : > { %s3197_s23 = scalar_lea.vmem %s3822_s0, %s2877_s20 }
   0xf   : > { %v3200_v0 = vld [vmem:[%s3197_s23 + $0x20] sm:$0xff]  ;;  %v3203_v1 = vld [vmem:[%s3197_s23 + $0x28] sm:$0xff]  ;;  %v3206_v2 = vld [vmem:[%s3197_s23 + $0x10] sm:$0xff] }
  0x10   : > { %v2907_v3 = vpack.i.bf16 %v3203_v1, %v3200_v0  ;;  %v3211_v4 = vld [vmem:[%s3197_s23 + $0x18] sm:$0xff]  ;;  %v225_v6 = vld [vmem:[%s3197_s23] sm:$0xff]  ;;  %v3220_v8 = vld [vmem:[%s3197_s23 + $0x8] sm:$0xff]  ;;  %v2932_v11 = vpack.i.bf16 %v3200_v0, %v3206_v2  ;;  %v2952_v14 = vpack.i.bf16 %v3203_v1, %v3206_v2 }
  0x11   : > { %v2897_v5 = vpack.i.bf16 %v3211_v4, %v3206_v2  ;;  %v2917_v7 = vpack.i.bf16 %v3211_v4, %v225_v6  ;;  %v2912_v9 = vpack.i.bf16 %v3206_v2, %v3220_v8  ;;  %v2902_v10 = vpack.i.bf16 %v3220_v8, %v225_v6  ;;  %v874_v16 = vld [vmem:[%s3197_s23 + $0x30] sm:$0xff] }
  0x12   : > { %2908 = vrot.lane.b32.xlu1 %v2907_v3, %s3143_s24  ;;  %v2937_v12 = vpack.i.bf16 %v3211_v4, %v3203_v1  ;;  %v2947_v13 = vpack.i.bf16 %v3200_v0, %v3211_v4  ;;  %v2962_v15 = vpack.i.bf16 %v3200_v0, %v3220_v8  ;;  %v2977_v17 = vpack.i.bf16 %v3203_v1, %v3211_v4 }
  0x13   : > { %2898 = vrot.lane.b32.xlu0 %v2897_v5, %s3143_s24  ;;  %2918 = vrot.lane.b32.xlu2 %v2917_v7, %s3144_s25  ;;  %v2972_v18 = vpack.i.bf16 %v874_v16, %v3203_v1  ;;  %v2982_v19 = vpack.i.bf16 %v3200_v0, %v874_v16  ;;  %v2997_v20 = vpack.i.bf16 %v874_v16, %v3211_v4 }
  0x1a   : > { %2913 = vrot.lane.b32.xlu1 %v2912_v9, %s3144_s25 }
  0x1b   : > { %2903 = vrot.lane.b32.xlu0 %v2902_v10, %s3143_s24  ;;  %2923 = vrot.lane.b32.xlu2 %v2902_v10, %s3145_s26 }
  0x22   : > { %2933 = vrot.lane.b32.xlu1 %v2932_v11, %s3145_s26 }
  0x23   : > { %2928 = vrot.lane.b32.xlu0 %v2907_v3, %s3144_s25  ;;  %2938 = vrot.lane.b32.xlu2 %v2937_v12, %s3145_s26 }
  0x2a   : > { %2948 = vrot.lane.b32.xlu1 %v2947_v13, %s3146_s27 }
  0x2b   : > { %2943 = vrot.lane.b32.xlu0 %v2902_v10, %s3146_s27  ;;  %2953 = vrot.lane.b32.xlu2 %v2952_v14, %s3146_s27 }
  0x32   : > { %2963 = vrot.lane.b32.xlu1 %v2962_v15, %s3147_s28 }
  0x33   : > { %2958 = vrot.lane.b32.xlu0 %v2897_v5, %s3147_s28  ;;  %2968 = vrot.lane.b32.xlu2 %v2912_v9, %s3148_s29 }
  0x3a   : > { %2978 = vrot.lane.b32.xlu1 %v2977_v17, %s3148_s29 }
  0x3b   : > { %2973 = vrot.lane.b32.xlu0 %v2972_v18, %s3147_s28  ;;  %2983 = vrot.lane.b32.xlu2 %v2982_v19, %s3148_s29  ;;  %v2781_v19 = vld [vmem:[%s3823_s1 + $0x18] sm:$0xff] }
  0x42   : > { %2993 = vrot.lane.b32.xlu1 %v2907_v3, %s3149_s30 }
  0x43   : > { %2988 = vrot.lane.b32.xlu0 %v2912_v9, %s3149_s30  ;;  %2998 = vrot.lane.b32.xlu2 %v2997_v20, %s3149_s30 }
  0x4a   : > { %3008 = vrot.lane.b32.xlu1 %v2912_v9, %s3150_s6 }
  0x4b   : > { %3003 = vrot.lane.b32.xlu0 %v2947_v13, %s3150_s6  ;;  %1290 = vrot.lane.b32.xlu2 %v3203_v1, %s3150_s6 }
  0x53   : > { %1292 = vrot.lane.b32.xlu0 %v874_v16, %s3150_s6 }
  0x6d   : > { %v2919_v21 = vpop.permute.xlu2 %2918 }
  0x6e   : > { %v2921_v31 = vunpack.i.h.bf16 %v2919_v21  ;;  %v2920_v35 = vunpack.i.l.bf16 %v2919_v21 }
  0x75   : > { %v2924_v25 = vpop.permute.xlu2 %2923 }
  0x76   : > { %v2926_v37 = vunpack.i.h.bf16 %v2924_v25  ;;  %v2925_v41 = vunpack.i.l.bf16 %v2924_v25 }
  0x78   : > { %v508_v50 = vsel %vm3833_vm3, %v2925_v41, %v2926_v37 }
  0x7d   : > { %v2939_v44 = vpop.permute.xlu2 %2938 }
  0x7e   : > { %v2940_v51 = vunpack.i.l.bf16 %v2939_v44  ;;  %v2941_v53 = vunpack.i.h.bf16 %v2939_v44  ;;  %v2793_v44 = vld [vmem:[%s3823_s1 + $0x28] sm:$0xff] }
  0x84   : > { %v2909_v22 = vpop.permute.xlu1 %2908 }
  0x85   : > { %v2910_v23 = vunpack.i.l.bf16 %v2909_v22  ;;  %v2899_v24 = vpop.permute.xlu0 %2898  ;;  %v2911_v38 = vunpack.i.h.bf16 %v2909_v22  ;;  %v2954_v6 = vpop.permute.xlu2 %2953 }
  0x86   : > { %v2901_v26 = vunpack.i.h.bf16 %v2899_v24  ;;  %v2900_v27 = vunpack.i.l.bf16 %v2899_v24  ;;  %v2956_v9 = vunpack.i.h.bf16 %v2954_v6  ;;  %v2955_v13 = vunpack.i.l.bf16 %v2954_v6 }
  0x87   : > { %v257_v49 = vsel %vm3836_vm0, %v2910_v23, %v2911_v38 }
  0x88   : > { %v255_v29 = vsel %vm3836_vm0, %v2900_v27, %v2901_v26  ;;  %v256_v30 = vsel %vm3836_vm0, %v2901_v26, %v2910_v23 }
  0x89   : > { %322 = vmatpush.msra.mxu2 %v255_v29  ;;  %342 = vmatpush.msra.mxu3 %v256_v30 }
  0x8a   : > { %2767 = vmatmul.msk.f32.vlgmr.msra.gmra.mxu2 %vm3835_vm1, %v2764_v28  ;;  %2768 = vmatmul.msk.f32.vlgmr.msra.gmra.mxu3 %vm3835_vm1, %v2764_v28 }
  0x8c   : > { %v2914_v32 = vpop.permute.xlu1 %2913 }
  0x8d   : > { %v2916_v33 = vunpack.i.h.bf16 %v2914_v32  ;;  %v2915_v34 = vunpack.i.l.bf16 %v2914_v32  ;;  %v2904_v36 = vpop.permute.xlu0 %2903 }
  0x8e   : > { %v2906_v39 = vunpack.i.h.bf16 %v2904_v36  ;;  %v2905_v40 = vunpack.i.l.bf16 %v2904_v36 }
  0x8f   : > { %v381_v42 = vsel %vm3834_vm2, %v2915_v34, %v2916_v33  ;;  %v382_v43 = vsel %vm3834_vm2, %v2916_v33, %v2921_v31  ;;  %v380_v48 = vsel %vm3834_vm2, %v2920_v35, %v2915_v34  ;;  %v2787_v34 = vld [vmem:[%s3823_s1 + $0x20] sm:$0xff] }
  0x90   : > { %v253_v45 = vsel %vm3836_vm0, %v2905_v40, %v2906_v39  ;;  %v254_v46 = vsel %vm3836_vm0, %v2906_v39, %v2900_v27  ;;  %428 = vmatpush.msrb.mxu2 %v381_v42  ;;  %448 = vmatpush.msrb.mxu3 %v382_v43  ;;  %v2969_v27 = vpop.permute.xlu2 %2968 }
  0x91   : > { %282 = vmatpush.msra.mxu0 %v253_v45  ;;  %302 = vmatpush.msra.mxu1 %v254_v46  ;;  %v2971_v32 = vunpack.i.h.bf16 %v2969_v27  ;;  %v2970_v33 = vunpack.i.l.bf16 %v2969_v27 }
  0x92   : > { %2765 = vmatmul.msk.f32.vlgmr.msra.gmra.mxu0 %vm3835_vm1, %v2764_v28  ;;  %2766 = vmatmul.msk.f32.vlgmr.msra.gmra.mxu1 %vm3835_vm1, %v2764_v28 }
  0x93   : > { %362 = vmatpush.msrb.mxu0 %v257_v49  ;;  %2771 = vmatmul.msk.f32.vlgmr.msrb.gmra.mxu2 %vm3835_vm1, %v231_v47 }
  0x94   : > { %2772 = vmatmul.msk.f32.vlgmr.msrb.gmra.mxu3 %vm3835_vm1, %v231_v47  ;;  %v2934_v52 = vpop.permute.xlu1 %2933  ;;  %408 = vmatpush.msrb.mxu1 %v380_v48 }
  0x95   : > { %v2936_v54 = vunpack.i.h.bf16 %v2934_v52  ;;  %v2935_v55 = vunpack.i.l.bf16 %v2934_v52  ;;  %v2929_v56 = vpop.permute.xlu0 %2928  ;;  %536 = vmatpush.msra.mxu2 %v508_v50 }
  0x96   : > { %v2931_v57 = vunpack.i.h.bf16 %v2929_v56  ;;  %v2930_v58 = vunpack.i.l.bf16 %v2929_v56 }
  0x97   : > { %v509_v59 = vsel %vm3833_vm3, %v2926_v37, %v2935_v55  ;;  %v512_v60 = vsel %vm3833_vm3, %v2936_v54, %v2940_v51  ;;  %v510_v3 = vsel %vm3833_vm3, %v2935_v55, %v2941_v53  ;;  %v511_v5 = vsel %vm3833_vm3, %v2941_v53, %v2936_v54  ;;  %v2799_v54 = vld [vmem:[%s3823_s1 + $0x30] sm:$0xff] }
  0x98   : > { %v383_v61 = vsel %vm3834_vm2, %v2921_v31, %v2930_v58  ;;  %556 = vmatpush.msra.mxu3 %v509_v59  ;;  %v384_v63 = vsel %vm3834_vm2, %v2930_v58, %v2931_v57  ;;  %616 = vmatpush.msrb.mxu2 %v512_v60 }
  0x99   : > { %468 = vmatpush.msra.mxu0 %v383_v61  ;;  %488 = vmatpush.msra.mxu1 %v384_v63 }
  0x9a   : > { %2769 = vmatmul.msk.f32.vlgmr.msrb.gmra.mxu0 %vm3835_vm1, %v2764_v28  ;;  %2770 = vmatmul.msk.f32.vlgmr.msrb.gmra.mxu1 %vm3835_vm1, %v231_v47 }
  0x9b   : > { %2776 = vmatmul.msk.f32.vlgmr.msra.gmra.mxu2 %vm3835_vm1, %v2775_v62  ;;  %576 = vmatpush.msrb.mxu0 %v510_v3 }
  0x9c   : > { %2777 = vmatmul.msk.f32.vlgmr.msra.gmra.mxu3 %vm3835_vm1, %v2775_v62  ;;  %596 = vmatpush.msrb.mxu1 %v511_v5  ;;  %v2949_v7 = vpop.permute.xlu1 %2948  ;;  %v2805_v5 = vld [vmem:[%s3823_s1 + $0x38] sm:$0xff] }
  0x9d   : > { %v2944_v10 = vpop.permute.xlu0 %2943  ;;  %v2951_v11 = vunpack.i.h.bf16 %v2949_v7  ;;  %v2950_v12 = vunpack.i.l.bf16 %v2949_v7 }
  0x9e   : > { %v2946_v14 = vunpack.i.h.bf16 %v2944_v10  ;;  %v2945_v15 = vunpack.i.l.bf16 %v2944_v10 }
  0x9f   : > { %v644_v16 = vsel %vm3832_vm4, %v2950_v12, %v2951_v11  ;;  %v645_v18 = vsel %vm3832_vm4, %v2951_v11, %v2956_v9  ;;  %v643_v21 = vsel %vm3832_vm4, %v2955_v13, %v2950_v12  ;;  %v1464_v12 = vld [vmem:[%s3824_s2] sm:$0xff] }
  0xa0   : > { %v641_v17 = vsel %vm3832_vm4, %v2945_v15, %v2946_v14  ;;  %729 = vmatpush.msra.mxu2 %v644_v16  ;;  %v642_v20 = vsel %vm3832_vm4, %v2946_v14, %v2955_v13  ;;  %v3151_v14 = vmov 0  }
  0xa1   : > { %669 = vmatpush.msrb.mxu3 %v641_v17  ;;  %3012 = vset.pattern.permute.xlu1 %v3151_v14 }
  0xa2   : > { %2773 = vmatmul.msk.f32.vlgmr.msra.gmra.mxu0 %vm3835_vm1, %v231_v47  ;;  %2774 = vmatmul.msk.f32.vlgmr.msra.gmra.mxu1 %vm3835_vm1, %v231_v47 }
  0xa3   : > { %2780 = vmatmul.msk.f32.vlgmr.msrb.gmra.mxu2 %vm3835_vm1, %v2775_v62  ;;  %749 = vmatpush.msra.mxu3 %v645_v18  ;;  %v2811_v18 = vld [vmem:[%s3823_s1 + $0x40] sm:$0xff] }
  0xa4   : > { %2782 = vmatmul.msk.f32.vlgmr.msrb.gmra.mxu3 %vm3835_vm1, %v2781_v19  ;;  %689 = vmatpush.msra.mxu0 %v642_v20  ;;  %v2964_v22 = vpop.permute.xlu1 %2963 }
  0xa5   : > { %709 = vmatpush.msra.mxu1 %v643_v21  ;;  %819 = vmatpush.msrb.mxu2 %v3211_v4  ;;  %v2959_v23 = vpop.permute.xlu0 %2958  ;;  %v2966_v24 = vunpack.i.h.bf16 %v2964_v22 }
  0xa6   : > { %839 = vmatpush.msrb.mxu3 %v3200_v0  ;;  %v2961_v25 = vunpack.i.h.bf16 %v2959_v23  ;;  %v2960_v26 = vunpack.i.l.bf16 %v2959_v23  ;;  %v2965_v0 = vunpack.i.l.bf16 %v2964_v22  ;;  %3133 = vset.pattern.permute.xlu2 %v3151_v14 }
  0xa7   : > { %1467 = vperm.xlu1 %3012, %v1464_v12   ;;  %3134 = vset.pattern.permute.xlu0 %v3151_v14 }
  0xa8   : > { %v897_v28 = vsel %vm3831_vm5, %v2960_v26, %v2961_v25  ;;  %v898_v29 = vsel %vm3831_vm5, %v2961_v25, %v2966_v24  ;;  %v896_v35 = vsel %vm3831_vm5, %v2965_v0, %v2960_v26 }
  0xaa   : > { %2778 = vmatmul.msk.f32.vlgmr.msrb.gmra.mxu0 %vm3835_vm1, %v2775_v62  ;;  %2779 = vmatmul.msk.f32.vlgmr.msrb.gmra.mxu1 %vm3835_vm1, %v2775_v62 }
  0xab   : > { %2785 = vmatmul.msk.f32.vlgmr.msra.gmra.mxu2 %vm3835_vm1, %v2781_v19  ;;  %779 = vmatpush.msrb.mxu0 %v3220_v8  ;;  %v2984_v8 = vpop.permute.xlu2 %2983 }
  0xac   : > { %2786 = vmatmul.msk.f32.vlgmr.msra.gmra.mxu3 %vm3835_vm1, %v2781_v19  ;;  %799 = vmatpush.msrb.mxu1 %v3206_v2  ;;  %v2979_v4 = vpop.permute.xlu1 %2978  ;;  %v1029_v2 = vsel %vm3830_vm6, %v2970_v33, %v2971_v32  ;;  %v2985_v41 = vunpack.i.l.bf16 %v2984_v8  ;;  %v2986_v50 = vunpack.i.h.bf16 %v2984_v8 }
  0xad   : > { %944 = vmatpush.msra.mxu2 %v897_v28  ;;  %964 = vmatpush.msra.mxu3 %v898_v29  ;;  %v2974_v30 = vpop.permute.xlu0 %2973  ;;  %v2980_v31 = vunpack.i.l.bf16 %v2979_v4  ;;  %v2981_v40 = vunpack.i.h.bf16 %v2979_v4 }
  0xae   : > { %v2975_v37 = vunpack.i.l.bf16 %v2974_v30  ;;  %v2976_v38 = vunpack.i.h.bf16 %v2974_v30 }
  0xaf   : > { %v1030_v36 = vsel %vm3830_vm6, %v2971_v32, %v2980_v31  ;;  %v1031_v55 = vsel %vm3830_vm6, %v2980_v31, %v2986_v50  ;;  %v1032_v56 = vsel %vm3830_vm6, %v2986_v50, %v2981_v40 }
  0xb0   : > { %v899_v45 = vsel %vm3831_vm5, %v2966_v24, %v2975_v37  ;;  %v900_v46 = vsel %vm3831_vm5, %v2975_v37, %v2976_v38 }
  0xb2   : > { %2783 = vmatmul.msk.f32.vlgmr.msra.gmra.mxu0 %vm3835_vm1, %v2781_v19  ;;  %2784 = vmatmul.msk.f32.vlgmr.msra.gmra.mxu1 %vm3835_vm1, %v2781_v19 }
  0xb3   : > { %2790 = vmatmul.msk.f32.vlgmr.msrb.gmra.mxu2 %vm3835_vm1, %v2787_v34  ;;  %924 = vmatpush.msra.mxu1 %v896_v35  ;;  %v2999_v49 = vpop.permute.xlu2 %2998 }
  0xb4   : > { %2791 = vmatmul.msk.f32.vlgmr.msrb.gmra.mxu3 %vm3835_vm1, %v2787_v34  ;;  %859 = vmatpush.msra.mxu0 %v3203_v1  ;;  %v1033_v1 = vsel %vm3830_vm6, %v2981_v40, %v2985_v41  ;;  %v2994_v48 = vpop.permute.xlu1 %2993  ;;  %v3001_v53 = vunpack.i.h.bf16 %v2999_v49  ;;  %v3000_v60 = vunpack.i.l.bf16 %v2999_v49 }
  0xb5   : > { %1057 = vmatpush.msrb.mxu2 %v1029_v2  ;;  %1077 = vmatpush.msrb.mxu3 %v1030_v36  ;;  %v2989_v39 = vpop.permute.xlu0 %2988  ;;  %v2996_v51 = vunpack.i.h.bf16 %v2994_v48  ;;  %v2995_v52 = vunpack.i.l.bf16 %v2994_v48 }
  0xb6   : > { %v2991_v42 = vunpack.i.h.bf16 %v2989_v39  ;;  %v2990_v43 = vunpack.i.l.bf16 %v2989_v39 }
  0xb7   : > { %v1165_v57 = vsel %vm3829_vm7, %v2995_v52, %v2996_v51  ;;  %v1166_v58 = vsel %vm3829_vm7, %v2996_v51, %v3001_v53  ;;  %v1164_v6 = vsel %vm3829_vm7, %v3000_v60, %v2995_v52 }
  0xb8   : > { %v1162_v47 = vsel %vm3829_vm7, %v2990_v43, %v2991_v42  ;;  %v1163_v3 = vsel %vm3829_vm7, %v2991_v42, %v3000_v60 }
  0xba   : > { %2788 = vmatmul.msk.f32.vlgmr.msrb.gmra.mxu0 %vm3835_vm1, %v2787_v34  ;;  %2789 = vmatmul.msk.f32.vlgmr.msrb.gmra.mxu1 %vm3835_vm1, %v2787_v34 }
  0xbb   : > { %2795 = vmatmul.msk.f32.vlgmr.msra.gmra.mxu2 %vm3835_vm1, %v2793_v44  ;;  %984 = vmatpush.msrb.mxu0 %v899_v45  ;;  %v1291_v63 = vpop.permute.xlu2 %1290 }
  0xbc   : > { %2796 = vmatmul.msk.f32.vlgmr.msra.gmra.mxu3 %vm3835_vm1, %v2793_v44  ;;  %1004 = vmatpush.msrb.mxu1 %v900_v46  ;;  %v3009_v7 = vpop.permute.xlu1 %3008 }
  0xbd   : > { %1137 = vmatpush.msra.mxu2 %v1033_v1  ;;  %1190 = vmatpush.msra.mxu3 %v1162_v47  ;;  %v3004_v59 = vpop.permute.xlu0 %3003  ;;  %v3011_v11 = vunpack.i.h.bf16 %v3009_v7  ;;  %v3010_v13 = vunpack.i.l.bf16 %v3009_v7  ;;  %v1413_v47 = vlaneseq }
  0xbe   : > { %v3006_v61 = vunpack.i.h.bf16 %v3004_v59  ;;  %v3005_v62 = vunpack.i.l.bf16 %v3004_v59 }
  0xbf   : > { %v1295_v16 = vsel %vm3828_vm8, %v3010_v13, %v3011_v11  ;;  %v3389_v48 = vand.u32 127, %v1413_v47 }
  0xc0   : > { %v1298_v9 = vsel %vm3828_vm8, %v3006_v61, %v1291_v63  ;;  %v1297_v10 = vsel %vm3828_vm8, %v3005_v62, %v3006_v61  ;;  %v1296_v15 = vsel %vm3828_vm8, %v3011_v11, %v3005_v62 }
  0xc2   : > { %2792 = vmatmul.msk.f32.vlgmr.msra.gmra.mxu0 %vm3835_vm1, %v2787_v34  ;;  %2794 = vmatmul.msk.f32.vlgmr.msra.gmra.mxu1 %vm3835_vm1, %v2793_v44 }
  0xc3   : > { %2800 = vmatmul.msk.f32.vlgmr.msrb.gmra.mxu2 %vm3835_vm1, %v2799_v54  ;;  %1097 = vmatpush.msra.mxu0 %v1031_v55 }
  0xc4   : > { %2801 = vmatmul.msk.f32.vlgmr.msrb.gmra.mxu3 %vm3835_vm1, %v2799_v54  ;;  %1117 = vmatpush.msra.mxu1 %v1032_v56 }
  0xc5   : > { %1250 = vmatpush.msrb.mxu2 %v1165_v57  ;;  %1270 = vmatpush.msrb.mxu3 %v1166_v58  ;;  %v1293_v17 = vpop.permute.xlu0 %1292  ;;  %v3397_v58 = vadd.s32 384, %v3389_v48 }
  0xc6   : > { %v1299_v19 = vsel %vm3828_vm8, %v1291_v63, %v1293_v17 }
  0xc7   : > { %v1427_v12 = vshra.s32 %v3397_v58, 5 }
  0xc9   : > { %vm3417_vm11 = vcmp.ge.s32.totalorder %v1427_v12, 1  ;;  %vm3421_vm12 = vcmp.lt.s32.totalorder %v1427_v12, 17 }
  0xca   : > { %2797 = vmatmul.msk.f32.vlgmr.msrb.gmra.mxu0 %vm3835_vm1, %v2793_v44  ;;  %2798 = vmatmul.msk.f32.vlgmr.msrb.gmra.mxu1 %vm3835_vm1, %v2793_v44 }
  0xcb   : > { %2804 = vmatmul.msk.f32.vlgmr.msra.gmra.mxu2 %vm3835_vm1, %v2799_v54  ;;  %1210 = vmatpush.msrb.mxu0 %v1163_v3  ;;  %v3400_v3 = vadd.s32 128, %v3389_v48 }
  0xcc   : > { %2806 = vmatmul.msk.f32.vlgmr.msra.gmra.mxu3 %vm3835_vm1, %v2805_v5  ;;  %1230 = vmatpush.msrb.mxu1 %v1164_v6 }
  0xcd   : > { %1363 = vmatpush.msra.mxu2 %v1297_v10  ;;  %1383 = vmatpush.msra.mxu3 %v1298_v9 }
  0xd2   : > { %2802 = vmatmul.msk.f32.vlgmr.msra.gmra.mxu0 %vm3835_vm1, %v2799_v54  ;;  %2803 = vmatmul.msk.f32.vlgmr.msra.gmra.mxu1 %vm3835_vm1, %v2799_v54  ;;  %v3394_v54 = vadd.s32 256, %v3389_v48 }
  0xd3   : > { %2809 = vmatmul.msk.f32.vlgmr.msrb.gmra.mxu2 %vm3835_vm1, %v2805_v5  ;;  %1343 = vmatpush.msra.mxu1 %v1296_v15 }
  0xd4   : > { %2810 = vmatmul.msk.f32.vlgmr.msrb.gmra.mxu3 %vm3835_vm1, %v2805_v5  ;;  %1323 = vmatpush.msra.mxu0 %v1295_v16  ;;  %v1426_v7 = vshra.s32 %v3394_v54, 5  ;;  %v1424_v16 = vshra.s32 %v3389_v48, 5 }
  0xd6   : > { %vm3409_vm9 = vcmp.ge.s32.totalorder %v1426_v7, 1  ;;  %vm3413_vm10 = vcmp.lt.s32.totalorder %v1426_v7, 17  ;;  %vm3426_vm13 = vcmp.ge.s32.totalorder %v1424_v16, 1  ;;  %vm3430_vm14 = vcmp.lt.s32.totalorder %v1424_v16, 17 }
  0xd7   : > { %vm1441_vm15 = vmand %vm3409_vm9, %vm3413_vm10 }
  0xd8   : > { %vm1439_vm4 = vmand %vm3426_vm13, %vm3430_vm14 }
  0xda   : > { %2807 = vmatmul.msk.f32.vlgmr.msrb.gmra.mxu0 %vm3835_vm1, %v2805_v5  ;;  %2808 = vmatmul.msk.f32.vlgmr.msrb.gmra.mxu1 %vm3835_vm1, %v2805_v5 }
  0xdb   : > { %2814 = vmatmul.msk.f32.vlgmr.msra.gmra.mxu2 %vm3835_vm1, %v2811_v18  ;;  %1403 = vmatpush.msrb.mxu0 %v1299_v19 }
  0xdc   : > { %2815 = vmatmul.msk.f32.vlgmr.msra.gmra.mxu3 %vm3835_vm1, %v2811_v18 }
  0xe2   : > { %2812 = vmatmul.msk.f32.vlgmr.msra.gmra.mxu0 %vm3835_vm1, %v2811_v18  ;;  %2813 = vmatmul.msk.f32.vlgmr.msra.gmra.mxu1 %vm3835_vm1, %v2811_v18 }
  0xea   : > { %2816 = vmatmul.msk.f32.vlgmr.msrb.gmra.mxu0 %vm3835_vm1, %v2811_v18 }
 0x10d   : > { %v324_v20 = vpop.f32.mrf.mxu2  ;;  %v344_v21 = vpop.f32.mrf.mxu3 }
 0x10f   : > { %v284_v22 = vpop.f32.mrf.mxu0  ;;  %v304_v23 = vpop.f32.mrf.mxu1 }
 0x116   : > { %v430_v24 = vpop.f32.mrf.mxu2 }
 0x117   : > { %v450_v25 = vpop.f32.mrf.mxu3  ;;  %v364_v26 = vpop.f32.mrf.mxu0  ;;  %v431_v55 = vadd.f32 %v430_v24, %v304_v23 }
 0x118   : > { %v410_v27 = vpop.f32.mrf.mxu1  ;;  %v451_v52 = vadd.f32 %v450_v25, %v324_v20  ;;  %v1421_v25 = vand.u32 31, %v3394_v54 }
 0x119   : > { %v411_v56 = vadd.f32 %v410_v27, %v284_v22  ;;  %v1425_v22 = vshra.s32 %v3400_v3, 5  ;;  %v3888_v27 = vmov 0 }
 0x11a   : > { %vm3454_vm5 = vcmp.ge.s32.totalorder %v1421_v25, 1  ;;  %vm3488_vm6 = vcmp.lt.s32.totalorder %v1421_v25, 17 }
 0x11b   : > { %vm3442_vm8 = vcmp.ge.s32.totalorder %v1425_v22, 1  ;;  %vm3446_vm7 = vcmp.lt.s32.totalorder %v1425_v22, 17  ;;  %vm3484_vm0 = vmand %vm1441_vm15, %vm3454_vm5 }
 0x11e   : > { %v538_v28 = vpop.f32.mrf.mxu2 }
 0x11f   : > { %v558_v29 = vpop.f32.mrf.mxu3  ;;  %v470_v0 = vpop.f32.mrf.mxu0  ;;  %v621_v61 = vadd.f32 %v538_v28, %v411_v56 }
 0x120   : > { %v490_v4 = vpop.f32.mrf.mxu1  ;;  %v471_v57 = vadd.f32 %v470_v0, %v344_v21  ;;  %v622_v62 = vadd.f32 %v558_v29, %v431_v55  ;;  %v1422_v55 = vand.u32 31, %v3397_v58 }
 0x121   : > { %v491_v59 = vadd.f32 %v490_v4, %v364_v26  ;;  %v1419_v4 = vand.u32 31, %v3389_v48 }
 0x123   : > { %vm3463_vm3 = vcmp.ge.s32.totalorder %v1419_v4, 1  ;;  %vm3503_vm5 = vcmp.lt.s32.totalorder %v1419_v4, 17 }
 0x124   : > { %vm3499_vm2 = vmand %vm1439_vm4, %vm3463_vm3 }
 0x125   : > { %vm3874_vm3 = vmand %vm3442_vm8, %vm3446_vm7  ;;  %vm1447_vm7 = vcmp.ge.s32.totalorder %v1422_v55, 1 }
 0x126   : > { %v618_v30 = vpop.f32.mrf.mxu2  ;;  %vm3881_vm8 = vmand %vm3417_vm11, %vm3421_vm12 }
 0x127   : > { %v671_v31 = vpop.f32.mrf.mxu3  ;;  %v578_v32 = vpop.f32.mrf.mxu0  ;;  %v625_v5 = vadd.f32 %v618_v30, %v491_v59  ;;  %vm3573_vm10 = vmand %vm3881_vm8, %vm1447_vm7 }
 0x128   : > { %v598_v33 = vpop.f32.mrf.mxu1  ;;  %v623_v60 = vadd.f32 %v578_v32, %v451_v52  ;;  %v754_v9 = vadd.f32 %v671_v31, %v621_v61  ;;  %v1420_v32 = vand.u32 31, %v3400_v3 }
 0x129   : > { %v624_v63 = vadd.f32 %v598_v33, %v471_v57  ;;  %v3436_v33 = vadd.s32 512, %v3389_v48  ;;  %v1468_v48 = vpop.permute.xlu1 %1467 }
 0x12a   : > { %vm3471_vm1 = vcmp.ge.s32.totalorder %v1420_v32, 1  ;;  %vm3507_vm9 = vcmp.lt.s32.totalorder %v1420_v32, 17 }
 0x12b   : > { %vm3521_vm4 = vmand %vm3874_vm3, %vm3471_vm1  ;;  %v1423_v7 = vand.u32 31, %v3436_v33 }
 0x12c   : > { %vm3839_vm1 = vmand %vm3499_vm2, %vm3503_vm5 }
 0x12d   : > { %vm1448_vm3 = vcmp.ge.s32.totalorder %v1423_v7, 1  ;;  %vm3887_vm11 = vmand %vm3521_vm4, %vm3507_vm9  ;;  %vm3599_vm7 = vcmp.lt.s32.totalorder %v1423_v7, 17 }
 0x12e   : > { %v731_v34 = vpop.f32.mrf.mxu2 }
 0x12f   : > { %v751_v35 = vpop.f32.mrf.mxu3  ;;  %v691_v8 = vpop.f32.mrf.mxu0  ;;  %v757_v10 = vadd.f32 %v731_v34, %v624_v63 }
 0x130   : > { %v711_v2 = vpop.f32.mrf.mxu1  ;;  %v755_v11 = vadd.f32 %v691_v8, %v622_v62  ;;  %v758_v13 = vadd.f32 %v751_v35, %v625_v5 }
 0x131   : > { %v756_v6 = vadd.f32 %v711_v2, %v623_v60  ;;  %v2834_v60 = vld [vmem:[%s3825_s3 + $0x18] sm:$0xff] }
 0x136   : > { %v821_v36 = vpop.f32.mrf.mxu2 }
 0x137   : > { %v841_v37 = vpop.f32.mrf.mxu3  ;;  %v781_v38 = vpop.f32.mrf.mxu0  ;;  %v866_v14 = vadd.f32 %v821_v36, %v756_v6 }
 0x138   : > { %v801_v39 = vpop.f32.mrf.mxu1  ;;  %v867_v17 = vadd.f32 %v841_v37, %v757_v10  ;;  %v864_v18 = vadd.f32 %v781_v38, %v754_v9  ;;  %v2817_v38 = vld [vmem:[%s3825_s3 + $0x8] sm:$0xff] }
 0x139   : > { %v865_v19 = vadd.f32 %v801_v39, %v755_v11 }
 0x13e   : > { %v946_v40 = vpop.f32.mrf.mxu2 }
 0x13f   : > { %v966_v41 = vpop.f32.mrf.mxu3  ;;  %v3385_v42 = vpop.f32.mrf.mxu0  ;;  %v1010_v34 = vadd.f32 %v946_v40, %v865_v19 }
 0x140   : > { %v926_v43 = vpop.f32.mrf.mxu1  ;;  %v1011_v23 = vadd.f32 %v966_v41, %v866_v14  ;;  %v868_v39 = vadd.f32 %v3385_v42, %v758_v13 }
 0x141   : > { %v1009_v28 = vadd.f32 %v926_v43, %v864_v18 }
 0x146   : > { %v1059_v44 = vpop.f32.mrf.mxu2 }
 0x147   : > { %v1079_v45 = vpop.f32.mrf.mxu3  ;;  %v986_v46 = vpop.f32.mrf.mxu0  ;;  %v1142_v36 = vadd.f32 %v1059_v44, %v1009_v28  ;;  %v3890_v28 = vmov 0 }
 0x148   : > { %v3387_v1 = vpop.f32.mrf.mxu1  ;;  %v1012_v37 = vadd.f32 %v986_v46, %v867_v17  ;;  %v1143_v40 = vadd.f32 %v1079_v45, %v1010_v34  ;;  %v1428_v45 = vshra.s32 %v3436_v33, 5  ;;  %v3891_v28 = vsel %vm3599_vm7, 4294967295, %v3890_v28 }
 0x149   : > { %v1013_v63 = vadd.f32 %v3387_v1, %v868_v39 }
 0x14a   : > { %vm3532_vm13 = vcmp.ge.s32.totalorder %v1428_v45, 1  ;;  %vm3536_vm14 = vcmp.lt.s32.totalorder %v1428_v45, 17 }
 0x14b   : > { %vm1443_vm15 = vmand %vm3532_vm13, %vm3536_vm14  ;;  %vm3577_vm13 = vcmp.lt.s32.totalorder %v1422_v55, 17 }
 0x14c   : > { %vm3886_vm14 = vmand %vm3484_vm0, %vm3488_vm6 }
 0x14d   : > { %vm3595_vm12 = vmand %vm1443_vm15, %vm1448_vm3  ;;  %vm3892_vm3 = vcmask 261120  }
 0x14e   : > { %v3391_v49 = vpop.f32.mrf.mxu2  ;;  %v3889_v27 = vsel %vm3595_vm12, 4294967295, %v3888_v27  ;;  %vm3838_vm8 = vmand %vm3573_vm10, %vm3577_vm13 }
 0x14f   : > { %v1192_v50 = vpop.f32.mrf.mxu3  ;;  %v1099_v51 = vpop.f32.mrf.mxu0  ;;  %v1146_v14 = vadd.f32 %v3391_v49, %v1013_v63  ;;  %vm3837_vm15 = vmand %vm3595_vm12, %vm3599_vm7 }
 0x150   : > { %v1119_v53 = vpop.f32.mrf.mxu1  ;;  %v1144_v35 = vadd.f32 %v1099_v51, %v1011_v23  ;;  %v1275_v44 = vadd.f32 %v1192_v50, %v1142_v36 }
 0x151   : > { %v1145_v46 = vadd.f32 %v1119_v53, %v1012_v37 }
 0x156   : > { %v1252_v15 = vpop.f32.mrf.mxu2 }
 0x157   : > { %v3405_v20 = vpop.f32.mrf.mxu3  ;;  %v1212_v21 = vpop.f32.mrf.mxu0  ;;  %v1278_v57 = vadd.f32 %v1252_v15, %v1145_v46 }
 0x158   : > { %v1232_v24 = vpop.f32.mrf.mxu1  ;;  %v1276_v51 = vadd.f32 %v1212_v21, %v1143_v40  ;;  %v1279_v17 = vadd.f32 %v3405_v20, %v1146_v14 }
 0x159   : > { %v1277_v41 = vadd.f32 %v1232_v24, %v1144_v35  ;;  %v3152_v24 = vmov 0.0  }
 0x15e   : > { %v1365_v47 = vpop.f32.mrf.mxu2 }
 0x15f   : > { %v1410_v52 = vadd.f32 %v1365_v47, %v1277_v41  ;;  %v1385_v54 = vpop.f32.mrf.mxu3  ;;  %v1325_v56 = vpop.f32.mrf.mxu0 }
 0x160   : > { %v1408_v59 = vadd.f32 %v1325_v56, %v1275_v44  ;;  %v1345_v61 = vpop.f32.mrf.mxu1  ;;  %v1411_v9 = vadd.f32 %v1385_v54, %v1278_v57 }
 0x161   : > { %v3512_v3 = vadd.f32 %v1468_v48, %v1410_v52  ;;  %v1409_v5 = vadd.f32 %v1345_v61, %v1276_v51 }
 0x162   : > { %v3530_v1 = vadd.f32 %v1468_v48, %v1408_v59  ;;  %v3559_v18 = vadd.f32 %v1468_v48, %v1411_v9  ;;  %v1498_v9 = vld [vmem:[%s3825_s3] sm:$0xff] }
 0x163   : > { %v1477_v12 = vmax.f32 %v3512_v3, 0.0  ;;  %v3545_v13 = vadd.f32 %v1468_v48, %v1409_v5 }
 0x164   : > { %v1475_v15 = vmax.f32 %v3530_v1, 0.0  ;;  %v1478_v0 = vmax.f32 %v3559_v18, 0.0  ;;  %v2840_v18 = vld [vmem:[%s3825_s3 + $0x20] sm:$0xff] }
 0x165   : > { %v1476_v16 = vmax.f32 %v3545_v13, 0.0  ;;  %v1482_v21 = vsel %vm3886_vm14, %v1477_v12, 0.0  ;;  %vm3893_vm14 = vcmask 64512  }
 0x166   : > { %v1480_v49 = vsel %vm3839_vm1, %v1475_v15, 0.0  ;;  %v1483_v31 = vsel %vm3838_vm8, %v1478_v0, 0.0  ;;  %vm3896_vm8 = vmmov %vm3893_vm14 }
 0x167   : > { %v1481_v22 = vsel %vm3887_vm11, %v1476_v16, 0.0  ;;  %v1405_v23 = vpop.f32.mrf.mxu0  ;;  %v3013_v25 = vpack.i.bf16 %v1480_v49, %v3152_v24  ;;  %v3078_v35 = vpack.i.bf16 %v1483_v31, %v1482_v21  ;;  %vm3894_vm11 = vmmov %vm3892_vm3 }
 0x168   : > { %v1412_v26 = vadd.f32 %v1405_v23, %v1279_v17  ;;  %v3023_v29 = vpack.i.bf16 %v1482_v21, %v1481_v22  ;;  %v3073_v34 = vpack.i.bf16 %v1481_v22, %v1480_v49  ;;  %vm3897_vm1 = vmmov %vm3896_vm8 }
 0x169   : > { %3014 = vrot.lane.b32.xlu2 %v3013_v25, %s3143_s24 }
 0x16a   : > { %v3609_v4 = vadd.f32 %v1468_v48, %v1412_v26  ;;  %3024 = vrot.lane.b32.xlu0 %v3023_v29, %s3143_s24 }
 0x16c   : > { %v1479_v30 = vmax.f32 %v3609_v4, 0.0 }
 0x16e   : > { %v1484_v32 = vsel %vm3837_vm15, %v1479_v30, 0.0  ;;  %vm3895_vm15 = vmmov %vm3892_vm3 }
 0x16f   : > { %v3033_v33 = vpack.i.bf16 %v1484_v32, %v1483_v31  ;;  %v3083_v8 = vpack.i.bf16 0.0, %v1484_v32 }
 0x171   : > { %3019 = vrot.lane.b32.xlu2 %v3013_v25, %s3144_s25  ;;  %3034 = vrot.lane.b32.xlu1 %v3033_v33, %s3143_s24 }
 0x172   : > { %3029 = vrot.lane.b32.xlu0 %v3023_v29, %s3144_s25 }
 0x179   : > { %3044 = vrot.lane.b32.xlu2 %v3013_v25, %s3145_s26  ;;  %3039 = vrot.lane.b32.xlu1 %v3033_v33, %s3144_s25  ;;  %s3808_s25 = scalar_lea.vmem %s3827_s5, %s2878_s11 }
 0x17a   : > { %3049 = vrot.lane.b32.xlu0 %v3023_v29, %s3145_s26 }
 0x181   : > { %3054 = vrot.lane.b32.xlu2 %v3013_v25, %s3146_s27  ;;  %3064 = vrot.lane.b32.xlu1 %v3033_v33, %s3145_s26 }
 0x182   : > { %3059 = vrot.lane.b32.xlu0 %v3023_v29, %s3146_s27 }
 0x189   : > { %3074 = vrot.lane.b32.xlu2 %v3073_v34, %s3147_s28  ;;  %3069 = vrot.lane.b32.xlu1 %v3033_v33, %s3146_s27 }
 0x18a   : > { %3079 = vrot.lane.b32.xlu0 %v3078_v35, %s3147_s28 }
 0x191   : > { %3089 = vrot.lane.b32.xlu2 %v3073_v34, %s3148_s29  ;;  %3084 = vrot.lane.b32.xlu1 %v3083_v8, %s3147_s28 }
 0x192   : > { %3094 = vrot.lane.b32.xlu0 %v3078_v35, %s3148_s29 }
 0x199   : > { %3099 = vrot.lane.b32.xlu2 %v3073_v34, %s3149_s30  ;;  %3109 = vrot.lane.b32.xlu1 %v3083_v8, %s3148_s29 }
 0x19a   : > { %3104 = vrot.lane.b32.xlu0 %v3078_v35, %s3149_s30 }
 0x1a1   : > { %3119 = vrot.lane.b32.xlu2 %v3073_v34, %s3150_s6  ;;  %3114 = vrot.lane.b32.xlu1 %v3083_v8, %s3149_s30  ;;  %v2828_v34 = vld [vmem:[%s3825_s3 + $0x10] sm:$0xff] }
 0x1a2   : > { %3124 = vrot.lane.b32.xlu0 %v3078_v35, %s3150_s6 }
 0x1a9   : > { %3129 = vrot.lane.b32.xlu1 %v3083_v8, %s3150_s6 }
 0x1c3   : > { %v3015_v2 = vpop.permute.xlu2 %3014 }
 0x1c4   : > { %v3017_v36 = vunpack.i.h.bf16 %v3015_v2  ;;  %v3016_v37 = vunpack.i.l.bf16 %v3015_v2 }
 0x1c6   : > { %v1519_v39 = vsel %vm3892_vm3, %v3016_v37, %v3017_v36  ;;  %vm3898_vm3 = vcmask 269312  }
 0x1c7   : > { %1547 = vmatpush.msrb.mxu1 %v1519_v39 }
 0x1c8   : > { %2818 = vmatmul.msk.f32.vlgmr.msrb.gmra.mxu1 %vm3893_vm14, %v2817_v38  ;;  %vm3899_vm14 = vmmov %vm3894_vm11 }
 0x1cb   : > { %v3020_v40 = vpop.permute.xlu2 %3019 }
 0x1cc   : > { %v3022_v43 = vunpack.i.h.bf16 %v3020_v40  ;;  %v3021_v44 = vunpack.i.l.bf16 %v3020_v40 }
 0x1ce   : > { %v1644_v51 = vsel %vm3898_vm3, %v3021_v44, %v3022_v43 }
 0x1d3   : > { %v3045_v45 = vpop.permute.xlu2 %3044 }
 0x1d4   : > { %v3047_v61 = vunpack.i.h.bf16 %v3045_v45  ;;  %v3046_v63 = vunpack.i.l.bf16 %v3045_v45 }
 0x1db   : > { %v3055_v17 = vpop.permute.xlu2 %3054 }
 0x1dc   : > { %v3025_v41 = vpop.permute.xlu0 %3024  ;;  %v3057_v26 = vunpack.i.h.bf16 %v3055_v17  ;;  %v3056_v29 = vunpack.i.l.bf16 %v3055_v17 }
 0x1dd   : > { %v3027_v46 = vunpack.i.h.bf16 %v3025_v41  ;;  %v3026_v47 = vunpack.i.l.bf16 %v3025_v41 }
 0x1df   : > { %v1520_v48 = vsel %vm3894_vm11, %v3017_v36, %v3026_v47  ;;  %v1521_v42 = vsel %vm3895_vm15, %v3026_v47, %v3027_v46  ;;  %vm3900_vm15 = vmmov %vm3894_vm11  ;;  %vm3903_vm11 = vcmask 64512  }
 0x1e0   : > { %1567 = vmatpush.msrb.mxu2 %v1520_v48  ;;  %1587 = vmatpush.msrb.mxu3 %v1521_v42 }
 0x1e1   : > { %2819 = vmatmul.msk.f32.vlgmr.msrb.gmra.mxu2 %vm3896_vm8, %v2817_v38  ;;  %2820 = vmatmul.msk.f32.vlgmr.msrb.gmra.mxu3 %vm3897_vm1, %v2817_v38  ;;  %vm3901_vm1 = vmmov %vm3898_vm3 }
 0x1e2   : > { %1672 = vmatpush.msra.mxu2 %v1644_v51  ;;  %vm3902_vm8 = vmmov %vm3901_vm1 }
 0x1e3   : > { %v3035_v52 = vpop.permute.xlu1 %3034  ;;  %vm3904_vm3 = vmmov %vm3903_vm11  ;;  %v3075_v47 = vpop.permute.xlu2 %3074 }
 0x1e4   : > { %v3030_v54 = vpop.permute.xlu0 %3029  ;;  %v3037_v55 = vunpack.i.h.bf16 %v3035_v52  ;;  %v3036_v56 = vunpack.i.l.bf16 %v3035_v52  ;;  %vm3905_vm7 = vmmov %vm3904_vm3  ;;  %v3076_v13 = vunpack.i.l.bf16 %v3075_v47 }
 0x1e5   : > { %v3032_v57 = vunpack.i.h.bf16 %v3030_v54  ;;  %v3031_v59 = vunpack.i.l.bf16 %v3030_v54 }
 0x1e6   : > { %v1522_v5 = vsel %vm3899_vm14, %v3027_v46, %v3036_v56  ;;  %v1523_v7 = vsel %vm3900_vm15, %v3036_v56, %v3037_v55  ;;  %vm3906_vm14 = vmmov %vm3904_vm3  ;;  %vm3907_vm15 = vcmask 252928  }
 0x1e7   : > { %1607 = vmatpush.msra.mxu0 %v1522_v5  ;;  %1627 = vmatpush.msra.mxu1 %v1523_v7  ;;  %v1645_v10 = vsel %vm3901_vm1, %v3022_v43, %v3031_v59  ;;  %v1646_v11 = vsel %vm3902_vm8, %v3031_v59, %v3032_v57  ;;  %v1771_v14 = vsel %vm3907_vm15, %v3046_v63, %v3047_v61  ;;  %vm3908_vm8 = vmmov %vm3901_vm1 }
 0x1e8   : > { %1692 = vmatpush.msra.mxu3 %v1645_v10  ;;  %2821 = vmatmul.msk.f32.vlgmr.msra.gmra.mxu0 %vm3903_vm11, %v2817_v38 }
 0x1e9   : > { %2822 = vmatmul.msk.f32.vlgmr.msra.gmra.mxu1 %vm3904_vm3, %v2817_v38  ;;  %2823 = vmatmul.msk.f32.vlgmr.msra.gmra.mxu2 %vm3905_vm7, %v1498_v9  ;;  %vm3909_vm7 = vmmov %vm3907_vm15 }
 0x1ea   : > { %2824 = vmatmul.msk.f32.vlgmr.msra.gmra.mxu3 %vm3906_vm14, %v1498_v9  ;;  %1712 = vmatpush.msrb.mxu0 %v1646_v11  ;;  %vm3910_vm11 = vmmov %vm3909_vm7 }
 0x1eb   : > { %1799 = vmatpush.msrb.mxu3 %v1771_v14  ;;  %v3040_v49 = vpop.permute.xlu1 %3039  ;;  %vm3911_vm14 = vmmov %vm3904_vm3  ;;  %v3090_v3 = vpop.permute.xlu2 %3089 }
 0x1ec   : > { %v3050_v21 = vpop.permute.xlu0 %3049  ;;  %v3042_v22 = vunpack.i.h.bf16 %v3040_v49  ;;  %v3041_v23 = vunpack.i.l.bf16 %v3040_v49  ;;  %vm3912_vm15 = vmmov %vm3904_vm3  ;;  %v3092_v19 = vunpack.i.h.bf16 %v3090_v3  ;;  %v3091_v20 = vunpack.i.l.bf16 %v3090_v3 }
 0x1ed   : > { %v3052_v24 = vunpack.i.h.bf16 %v3050_v21  ;;  %v3051_v25 = vunpack.i.l.bf16 %v3050_v21 }
 0x1ee   : > { %v1647_v31 = vsel %vm3901_vm1, %v3032_v57, %v3041_v23  ;;  %v1648_v32 = vsel %vm3908_vm8, %v3041_v23, %v3042_v22  ;;  %vm3913_vm1 = vmmov %vm3904_vm3  ;;  %vm3914_vm8 = vcmask 7168  }
 0x1ef   : > { %1732 = vmatpush.msrb.mxu1 %v1647_v31  ;;  %1752 = vmatpush.msrb.mxu2 %v1648_v32  ;;  %v1772_v33 = vsel %vm3909_vm7, %v3047_v61, %v3051_v25  ;;  %v1773_v35 = vsel %vm3910_vm11, %v3051_v25, %v3052_v24  ;;  %v1903_v8 = vsel %vm3914_vm8, %v3056_v29, %v3057_v26  ;;  %vm3915_vm11 = vmmov %vm3909_vm7  ;;  %v2846_v61 = vld [vmem:[%s3825_s3 + $0x28] sm:$0xff]  ;;  %v2671_v31 = vld [vmem:[%s3826_s4] sm:$0xff] }
 0x1f0   : > { %1819 = vmatpush.msra.mxu0 %v1772_v33  ;;  %vm3920_vm12 = vmmov %vm3913_vm1  ;;  %2674 = vperm.xlu2 %3133, %v2671_v31  }
 0x1f1   : > { %1839 = vmatpush.msra.mxu1 %v1773_v35  ;;  %2825 = vmatmul.msk.f32.vlgmr.msrb.gmra.mxu0 %vm3904_vm3, %v1498_v9  ;;  %vm3916_vm3 = vmmov %vm3914_vm8 }
 0x1f2   : > { %2826 = vmatmul.msk.f32.vlgmr.msrb.gmra.mxu1 %vm3911_vm14, %v1498_v9  ;;  %2827 = vmatmul.msk.f32.vlgmr.msrb.gmra.mxu2 %vm3912_vm15, %v1498_v9  ;;  %vm3917_vm14 = vmmov %vm3916_vm3 }
 0x1f3   : > { %2829 = vmatmul.msk.f32.vlgmr.msrb.gmra.mxu3 %vm3913_vm1, %v2828_v34  ;;  %1931 = vmatpush.msrb.mxu0 %v1903_v8  ;;  %v3065_v2 = vpop.permute.xlu1 %3064  ;;  %vm3918_vm15 = vmmov %vm3913_vm1  ;;  %v3100_v63 = vpop.permute.xlu2 %3099 }
 0x1f4   : > { %v3060_v36 = vpop.permute.xlu0 %3059  ;;  %v3067_v37 = vunpack.i.h.bf16 %v3065_v2  ;;  %v3066_v38 = vunpack.i.l.bf16 %v3065_v2  ;;  %vm3919_vm8 = vmmov %vm3913_vm1  ;;  %v3102_v49 = vunpack.i.h.bf16 %v3100_v63  ;;  %v3101_v21 = vunpack.i.l.bf16 %v3100_v63 }
 0x1f5   : > { %v3062_v39 = vunpack.i.h.bf16 %v3060_v36  ;;  %v3061_v40 = vunpack.i.l.bf16 %v3060_v36 }
 0x1f6   : > { %v1774_v41 = vsel %vm3909_vm7, %v3052_v24, %v3066_v38  ;;  %v1775_v43 = vsel %vm3915_vm11, %v3066_v38, %v3067_v37  ;;  %vm3921_vm7 = vmand %vm3499_vm2, %vm3503_vm5  ;;  %v2852_v24 = vld [vmem:[%s3825_s3 + $0x30] sm:$0xff] }
 0x1f7   : > { %1859 = vmatpush.msra.mxu2 %v1774_v41  ;;  %1879 = vmatpush.msra.mxu3 %v1775_v43  ;;  %v1904_v44 = vsel %vm3916_vm3, %v3057_v26, %v3061_v40  ;;  %v1905_v46 = vsel %vm3917_vm14, %v3061_v40, %v3062_v39  ;;  %vm3922_vm11 = vmand %vm3521_vm4, %vm3507_vm9 }
 0x1f8   : > { %1951 = vmatpush.msrb.mxu1 %v1904_v44  ;;  %vm3924_vm2 = vmand %vm3484_vm0, %vm3488_vm6  ;;  %vm3930_vm0 = vnez %v3889_v27  ;;  %vm3931_vm6 = vnez %v3891_v28 }
 0x1f9   : > { %1971 = vmatpush.msrb.mxu2 %v1905_v46  ;;  %2830 = vmatmul.msk.f32.vlgmr.msra.gmra.mxu0 %vm3918_vm15, %v2828_v34  ;;  %vm3925_vm5 = vmmov %vm3913_vm1 }
 0x1fa   : > { %2831 = vmatmul.msk.f32.vlgmr.msra.gmra.mxu1 %vm3913_vm1, %v2828_v34  ;;  %2832 = vmatmul.msk.f32.vlgmr.msra.gmra.mxu2 %vm3919_vm8, %v2828_v34  ;;  %vm3926_vm9 = vmmov %vm3913_vm1  ;;  %vm3933_vm8 = vcmask 1039360  }
 0x1fb   : > { %2833 = vmatmul.msk.f32.vlgmr.msra.gmra.mxu3 %vm3920_vm12, %v2828_v34  ;;  %2872 = vmatpush.msk.msra.mxu1 %vm3921_vm7, %v1475_v15  ;;  %v3070_v48 = vpop.permute.xlu1 %3069  ;;  %vm3923_vm12 = vmmov %vm3916_vm3  ;;  %v3077_v15 = vunpack.i.h.bf16 %v3075_v47  ;;  %v3120_v32 = vpop.permute.xlu2 %3119  ;;  %v2858_v47 = vld [vmem:[%s3825_s3 + $0x38] sm:$0xff] }
 0x1fc   : > { %2873 = vmatpush.msk.msra.mxu2 %vm3922_vm11, %v1476_v16  ;;  %v3080_v42 = vpop.permute.xlu0 %3079  ;;  %v3072_v45 = vunpack.i.h.bf16 %v3070_v48  ;;  %v3071_v51 = vunpack.i.l.bf16 %v3070_v48  ;;  %vm3927_vm4 = vmmov %vm3913_vm1  ;;  %v3122_v35 = vunpack.i.h.bf16 %v3120_v32  ;;  %v3121_v8 = vunpack.i.l.bf16 %v3120_v32 }
 0x1fd   : > { %v3081_v52 = vunpack.i.l.bf16 %v3080_v42  ;;  %vm3928_vm14 = vmmov %vm3913_vm1  ;;  %v2157_v50 = vsel %vm3933_vm8, %v3076_v13, %v3077_v15  ;;  %v3082_v16 = vunpack.i.h.bf16 %v3080_v42 }
 0x1fe   : > { %v1906_v1 = vsel %vm3923_vm12, %v3062_v39, %v3071_v51  ;;  %v1907_v58 = vsel %vm3916_vm3, %v3071_v51, %v3072_v45  ;;  %vm3929_vm15 = vmand %vm3573_vm10, %vm3577_vm13  ;;  %v2864_v45 = vld [vmem:[%s3825_s3 + $0x40] sm:$0xff] }
 0x1ff   : > { %1991 = vmatpush.msrb.mxu3 %v1906_v1  ;;  %2011 = vmatpush.msra.mxu0 %v1907_v58  ;;  %vm3932_vm1 = vmand %vm3930_vm0, %vm3931_vm6 }
 0x200   : > { %vm3934_vm7 = vmmov %vm3933_vm8 }
 0x201   : > { %2874 = vmatpush.msk.msra.mxu3 %vm3924_vm2, %v1477_v12  ;;  %2835 = vmatmul.msk.f32.vlgmr.msrb.gmra.mxu0 %vm3925_vm5, %v2834_v60  ;;  %v2158_v53 = vsel %vm3934_vm7, %v3077_v15, %v3081_v52  ;;  %vm3935_vm10 = vmmov %vm3934_vm7 }
 0x202   : > { %2836 = vmatmul.msk.f32.vlgmr.msrb.gmra.mxu1 %vm3926_vm9, %v2834_v60  ;;  %2837 = vmatmul.msk.f32.vlgmr.msrb.gmra.mxu2 %vm3927_vm4, %v2834_v60  ;;  %vm3936_vm13 = vmmov %vm3927_vm4  ;;  %vm3942_vm9 = vcmask 793600  }
 0x203   : > { %2838 = vmatmul.msk.f32.vlgmr.msrb.gmra.mxu3 %vm3928_vm14, %v2834_v60  ;;  %2875 = vmatpush.msk.msrb.mxu0 %vm3929_vm15, %v1478_v0  ;;  %v3085_v62 = vpop.permute.xlu1 %3084  ;;  %vm3937_vm11 = vmmov %vm3927_vm4 }
 0x204   : > { %2876 = vmatpush.msk.msrb.mxu1 %vm3932_vm1, %v1479_v30  ;;  %2185 = vmatpush.msrb.mxu2 %v2157_v50  ;;  %v3086_v6 = vunpack.i.l.bf16 %v3085_v62  ;;  %v3087_v12 = vunpack.i.h.bf16 %v3085_v62  ;;  %v3095_v27 = vpop.permute.xlu0 %3094  ;;  %vm3938_vm12 = vmmov %vm3934_vm7  ;;  %v2289_v30 = vsel %vm3942_vm9, %v3091_v20, %v3092_v19 }
 0x205   : > { %2205 = vmatpush.msrb.mxu3 %v2158_v53  ;;  %vm3939_vm3 = vmmov %vm3927_vm4  ;;  %v3097_v57 = vunpack.i.h.bf16 %v3095_v27  ;;  %v3096_v59 = vunpack.i.l.bf16 %v3095_v27 }
 0x206   : > { %v2160_v28 = vsel %vm3935_vm10, %v3082_v16, %v3086_v6  ;;  %v2161_v0 = vsel %vm3938_vm12, %v3086_v6, %v3087_v12  ;;  %vm3940_vm2 = vmmov %vm3939_vm3 }
 0x207   : > { %vm3941_vm5 = vmmov %vm3934_vm7 }
 0x208   : > { %v2159_v4 = vsel %vm3941_vm5, %v3081_v52, %v3082_v16  ;;  %vm3943_vm4 = vmmov %vm3940_vm2 }
 0x209   : > { %2839 = vmatmul.msk.f32.vlgmr.msra.gmra.mxu0 %vm3936_vm13, %v2834_v60  ;;  %vm3944_vm14 = vmmov %vm3940_vm2 }
 0x20a   : > { %2841 = vmatmul.msk.f32.vlgmr.msra.gmra.mxu1 %vm3937_vm11, %v2840_v18  ;;  %2842 = vmatmul.msk.f32.vlgmr.msra.gmra.mxu2 %vm3939_vm3, %v2840_v18  ;;  %vm3945_vm15 = vmmov %vm3942_vm9  ;;  %vm3953_vm11 = vcmask 785408  }
 0x20b   : > { %2843 = vmatmul.msk.f32.vlgmr.msra.gmra.mxu3 %vm3940_vm2, %v2840_v18  ;;  %2225 = vmatpush.msra.mxu0 %v2159_v4  ;;  %v3110_v54 = vpop.permute.xlu1 %3109  ;;  %vm3946_vm0 = vmmov %vm3942_vm9 }
 0x20c   : > { %2245 = vmatpush.msra.mxu1 %v2160_v28  ;;  %2265 = vmatpush.msra.mxu2 %v2161_v0  ;;  %v3112_v55 = vunpack.i.h.bf16 %v3110_v54  ;;  %v3111_v56 = vunpack.i.l.bf16 %v3110_v54  ;;  %v3105_v9 = vpop.permute.xlu0 %3104  ;;  %vm3947_vm6 = vmmov %vm3940_vm2 }
 0x20d   : > { %2317 = vmatpush.msra.mxu3 %v2289_v30  ;;  %vm3948_vm1 = vmmov %vm3940_vm2  ;;  %v3106_v22 = vunpack.i.l.bf16 %v3105_v9  ;;  %v3107_v23 = vunpack.i.h.bf16 %v3105_v9 }
 0x20e   : > { %v2292_v5 = vsel %vm3945_vm15, %v3097_v57, %v3111_v56  ;;  %v2293_v7 = vsel %vm3946_vm0, %v3111_v56, %v3112_v55  ;;  %vm3949_vm8 = vmmov %vm3946_vm0 }
 0x20f   : > { %v2290_v10 = vsel %vm3949_vm8, %v3092_v19, %v3096_v59  ;;  %vm3950_vm7 = vmmov %vm3946_vm0 }
 0x210   : > { %v2291_v11 = vsel %vm3950_vm7, %v3096_v59, %v3097_v57  ;;  %vm3951_vm10 = vmmov %vm3948_vm1 }
 0x211   : > { %2844 = vmatmul.msk.f32.vlgmr.msrb.gmra.mxu0 %vm3943_vm4, %v2840_v18  ;;  %vm3952_vm13 = vmmov %vm3948_vm1 }
 0x212   : > { %2845 = vmatmul.msk.f32.vlgmr.msrb.gmra.mxu1 %vm3944_vm14, %v2840_v18  ;;  %2847 = vmatmul.msk.f32.vlgmr.msrb.gmra.mxu2 %vm3947_vm6, %v2846_v61  ;;  %vm3954_vm12 = vmmov %vm3948_vm1 }
 0x213   : > { %2848 = vmatmul.msk.f32.vlgmr.msrb.gmra.mxu3 %vm3948_vm1, %v2846_v61  ;;  %2337 = vmatpush.msrb.mxu0 %v2290_v10  ;;  %v3115_v14 = vpop.permute.xlu1 %3114  ;;  %vm3955_vm3 = vmmov %vm3948_vm1 }
 0x214   : > { %2357 = vmatpush.msrb.mxu1 %v2291_v11  ;;  %2377 = vmatpush.msrb.mxu2 %v2292_v5  ;;  %v3116_v17 = vunpack.i.l.bf16 %v3115_v14  ;;  %vm3956_vm2 = vmmov %vm3953_vm11  ;;  %v3125_v34 = vpop.permute.xlu0 %3124  ;;  %v3117_v2 = vunpack.i.h.bf16 %v3115_v14 }
 0x215   : > { %2397 = vmatpush.msrb.mxu3 %v2293_v7  ;;  %v2421_v26 = vsel %vm3956_vm2, %v3101_v21, %v3102_v49  ;;  %vm3957_vm5 = vmmov %vm3956_vm2  ;;  %v3127_v36 = vunpack.i.h.bf16 %v3125_v34  ;;  %v3126_v37 = vunpack.i.l.bf16 %v3125_v34 }
 0x216   : > { %v2424_v25 = vsel %vm3953_vm11, %v3107_v23, %v3116_v17  ;;  %v2422_v29 = vsel %vm3957_vm5, %v3102_v49, %v3106_v22  ;;  %vm3958_vm9 = vmmov %vm3956_vm2 }
 0x217   : > { %v2423_v33 = vsel %vm3958_vm9, %v3106_v22, %v3107_v23  ;;  %vm3959_vm4 = vmmov %vm3948_vm1 }
 0x218   : > { %vm3960_vm14 = vmmov %vm3948_vm1 }
 0x219   : > { %2849 = vmatmul.msk.f32.vlgmr.msra.gmra.mxu0 %vm3951_vm10, %v2846_v61  ;;  %vm3961_vm15 = vmmov %vm3948_vm1 }
 0x21a   : > { %2850 = vmatmul.msk.f32.vlgmr.msra.gmra.mxu1 %vm3952_vm13, %v2846_v61  ;;  %2851 = vmatmul.msk.f32.vlgmr.msra.gmra.mxu2 %vm3954_vm12, %v2846_v61  ;;  %vm3962_vm0 = vmmov %vm3948_vm1  ;;  %vm3964_vm1 = vcmask 777216  }
 0x21b   : > { %2853 = vmatmul.msk.f32.vlgmr.msra.gmra.mxu3 %vm3955_vm3, %v2852_v24  ;;  %2449 = vmatpush.msra.mxu0 %v2421_v26  ;;  %vm3963_vm6 = vmmov %vm3956_vm2  ;;  %v2553_v39 = vsel %vm3964_vm1, %v3121_v8, %v3122_v35  ;;  %v3130_v40 = vpop.permute.xlu1 %3129 }
 0x21c   : > { %2469 = vmatpush.msra.mxu1 %v2422_v29  ;;  %2489 = vmatpush.msra.mxu2 %v2423_v33  ;;  %v2425_v38 = vsel %vm3963_vm6, %v3116_v17, %v3117_v2  ;;  %vm3965_vm8 = vmmov %vm3964_vm1  ;;  %v3132_v44 = vunpack.i.h.bf16 %v3130_v40  ;;  %v3131_v46 = vunpack.i.l.bf16 %v3130_v40 }
 0x21d   : > { %2509 = vmatpush.msra.mxu3 %v2424_v25  ;;  %v2554_v41 = vsel %vm3965_vm8, %v3122_v35, %v3126_v37  ;;  %vm3966_vm7 = vmmov %vm3964_vm1 }
 0x21e   : > { %v2555_v43 = vsel %vm3966_vm7, %v3126_v37, %v3127_v36  ;;  %vm3967_vm10 = vmmov %vm3962_vm0 }
 0x21f   : > { %vm3968_vm13 = vmmov %vm3962_vm0 }
 0x220   : > { %vm3969_vm11 = vmmov %vm3962_vm0 }
 0x221   : > { %2854 = vmatmul.msk.f32.vlgmr.msrb.gmra.mxu0 %vm3959_vm4, %v2852_v24  ;;  %vm3970_vm12 = vmmov %vm3962_vm0 }
 0x222   : > { %2855 = vmatmul.msk.f32.vlgmr.msrb.gmra.mxu1 %vm3960_vm14, %v2852_v24  ;;  %2856 = vmatmul.msk.f32.vlgmr.msrb.gmra.mxu2 %vm3961_vm15, %v2852_v24  ;;  %vm3971_vm3 = vmmov %vm3964_vm1 }
 0x223   : > { %2857 = vmatmul.msk.f32.vlgmr.msrb.gmra.mxu3 %vm3962_vm0, %v2852_v24  ;;  %2529 = vmatpush.msrb.mxu0 %v2425_v38  ;;  %v2556_v48 = vsel %vm3971_vm3, %v3127_v36, %v3131_v46  ;;  %vm3972_vm2 = vmmov %vm3964_vm1 }
 0x224   : > { %2581 = vmatpush.msrb.mxu1 %v2553_v39  ;;  %2601 = vmatpush.msrb.mxu2 %v2554_v41  ;;  %v2557_v42 = vsel %vm3972_vm2, %v3131_v46, %v3132_v44  ;;  %vm3973_vm5 = vmmov %vm3962_vm0 }
 0x225   : > { %2621 = vmatpush.msrb.mxu3 %v2555_v43  ;;  %vm3974_vm9 = vmmov %vm3962_vm0 }
 0x226   : > { %vm3975_vm4 = vmmov %vm3962_vm0 }
 0x227   : > { %vm3976_vm14 = vmmov %vm3962_vm0 }
 0x228   : > { %vm3977_vm15 = vmmov %vm3962_vm0 }
 0x229   : > { %2859 = vmatmul.msk.f32.vlgmr.msra.gmra.mxu0 %vm3967_vm10, %v2858_v47 }
 0x22a   : > { %2860 = vmatmul.msk.f32.vlgmr.msra.gmra.mxu1 %vm3968_vm13, %v2858_v47  ;;  %2861 = vmatmul.msk.f32.vlgmr.msra.gmra.mxu2 %vm3969_vm11, %v2858_v47 }
 0x22b   : > { %2862 = vmatmul.msk.f32.vlgmr.msra.gmra.mxu3 %vm3970_vm12, %v2858_v47  ;;  %2641 = vmatpush.msra.mxu0 %v2556_v48 }
 0x22c   : > { %2661 = vmatpush.msra.mxu1 %v2557_v42 }
 0x231   : > { %2863 = vmatmul.msk.f32.vlgmr.msrb.gmra.mxu0 %vm3973_vm5, %v2858_v47 }
 0x232   : > { %2865 = vmatmul.msk.f32.vlgmr.msrb.gmra.mxu1 %vm3974_vm9, %v2864_v45  ;;  %2866 = vmatmul.msk.f32.vlgmr.msrb.gmra.mxu2 %vm3975_vm4, %v2864_v45 }
 0x233   : > { %2867 = vmatmul.msk.f32.vlgmr.msrb.gmra.mxu3 %vm3976_vm14, %v2864_v45 }
 0x239   : > { %2868 = vmatmul.msk.f32.vlgmr.msra.gmra.mxu0 %vm3977_vm15, %v2864_v45 }
 0x23a   : > { %2869 = vmatmul.msk.f32.vlgmr.msra.gmra.mxu1 %vm3962_vm0, %v2864_v45 }
 0x245   : > { %v1549_v51 = vpop.f32.mrf.mxu1 }
 0x24a   : > { %v2675_v38 = vpop.permute.xlu2 %2674 }
 0x264   : > { %v1569_v1 = vpop.f32.mrf.mxu2  ;;  %v1589_v58 = vpop.f32.mrf.mxu3 }
 0x265   : > { %v1609_v60 = vpop.f32.mrf.mxu0 }
 0x266   : > { %v1629_v15 = vpop.f32.mrf.mxu1 }
 0x26c   : > { %v1674_v13 = vpop.f32.mrf.mxu2 }
 0x26d   : > { %v1694_v52 = vpop.f32.mrf.mxu3  ;;  %v1675_v11 = vadd.f32 %v1674_v13, %v1549_v51 }
 0x26e   : > { %v1714_v50 = vpop.f32.mrf.mxu0  ;;  %v1695_v25 = vadd.f32 %v1694_v52, %v1569_v1 }
 0x26f   : > { %v1734_v53 = vpop.f32.mrf.mxu1  ;;  %v1715_v26 = vadd.f32 %v1714_v50, %v1589_v58 }
 0x270   : > { %v1735_v29 = vadd.f32 %v1734_v53, %v1609_v60 }
 0x275   : > { %v1754_v62 = vpop.f32.mrf.mxu2 }
 0x276   : > { %v1801_v3 = vpop.f32.mrf.mxu3  ;;  %v1821_v6 = vpop.f32.mrf.mxu0  ;;  %v1755_v31 = vadd.f32 %v1754_v62, %v1629_v15  ;;  %v2682_v62 = vld [vmem:[%s3197_s23 + $0x8] sm:$0xff] }
 0x277   : > { %v1841_v12 = vpop.f32.mrf.mxu1  ;;  %v1884_v14 = vadd.f32 %v1801_v3, %v1675_v11  ;;  %v1885_v33 = vadd.f32 %v1821_v6, %v1695_v25 }
 0x278   : > { %v1886_v34 = vadd.f32 %v1841_v12, %v1715_v26 }
 0x27d   : > { %v1861_v16 = vpop.f32.mrf.mxu2 }
 0x27e   : > { %v1881_v18 = vpop.f32.mrf.mxu3  ;;  %v1933_v19 = vpop.f32.mrf.mxu0  ;;  %v1887_v35 = vadd.f32 %v1861_v16, %v1735_v29 }
 0x27f   : > { %v1953_v20 = vpop.f32.mrf.mxu1  ;;  %v2016_v17 = vadd.f32 %v1933_v19, %v1884_v14  ;;  %v1888_v8 = vadd.f32 %v1881_v18, %v1755_v31  ;;  %v2685_v14 = vld [vmem:[%s3197_s23 + $0x20] sm:$0xff] }
 0x280   : > { %v2017_v36 = vadd.f32 %v1953_v20, %v1885_v33 }
 0x285   : > { %v1973_v27 = vpop.f32.mrf.mxu2 }
 0x286   : > { %v1993_v28 = vpop.f32.mrf.mxu3  ;;  %v2013_v0 = vpop.f32.mrf.mxu0  ;;  %v2018_v37 = vadd.f32 %v1973_v27, %v1886_v34 }
 0x287   : > { %v2043_v4 = vpop.f32.mrf.mxu1  ;;  %v2019_v39 = vadd.f32 %v1993_v28, %v1887_v35  ;;  %v2020_v40 = vadd.f32 %v2013_v0, %v1888_v8 }
 0x288   : > { %v2126_v24 = vadd.f32 %v2043_v4, %v2016_v17  ;;  %v2686_v17 = vld [vmem:[%s3197_s23 + $0x28] sm:$0xff] }
 0x28d   : > { %v2063_v30 = vpop.f32.mrf.mxu2 }
 0x28e   : > { %v2083_v54 = vpop.f32.mrf.mxu3  ;;  %v2103_v55 = vpop.f32.mrf.mxu0  ;;  %v2127_v46 = vadd.f32 %v2063_v30, %v2017_v36 }
 0x28f   : > { %v2123_v56 = vpop.f32.mrf.mxu1  ;;  %v2128_v47 = vadd.f32 %v2083_v54, %v2018_v37  ;;  %v2129_v45 = vadd.f32 %v2103_v55, %v2019_v39 }
 0x290   : > { %v2130_v51 = vadd.f32 %v2123_v56, %v2020_v40 }
 0x295   : > { %v2187_v57 = vpop.f32.mrf.mxu2 }
 0x296   : > { %v2207_v59 = vpop.f32.mrf.mxu3  ;;  %v2227_v61 = vpop.f32.mrf.mxu0  ;;  %v2270_v32 = vadd.f32 %v2187_v57, %v2126_v24 }
 0x297   : > { %v2247_v63 = vpop.f32.mrf.mxu1  ;;  %v2271_v58 = vadd.f32 %v2207_v59, %v2127_v46  ;;  %v2272_v60 = vadd.f32 %v2227_v61, %v2128_v47 }
 0x298   : > { %v2273_v15 = vadd.f32 %v2247_v63, %v2129_v45  ;;  %v2683_v63 = vld [vmem:[%s3197_s23 + $0x10] sm:$0xff] }
 0x29d   : > { %v2267_v5 = vpop.f32.mrf.mxu2 }
 0x29e   : > { %v2319_v7 = vpop.f32.mrf.mxu3  ;;  %v2339_v9 = vpop.f32.mrf.mxu0  ;;  %v2274_v13 = vadd.f32 %v2267_v5, %v2130_v51  ;;  %v2684_v5 = vld [vmem:[%s3197_s23 + $0x18] sm:$0xff] }
 0x29f   : > { %v2359_v10 = vpop.f32.mrf.mxu1  ;;  %v2402_v2 = vadd.f32 %v2319_v7, %v2270_v32  ;;  %v2403_v50 = vadd.f32 %v2339_v9, %v2271_v58 }
 0x2a0   : > { %v2404_v53 = vadd.f32 %v2359_v10, %v2272_v60 }
 0x2a5   : > { %v2379_v49 = vpop.f32.mrf.mxu2 }
 0x2a6   : > { %v2399_v21 = vpop.f32.mrf.mxu3  ;;  %v2451_v22 = vpop.f32.mrf.mxu0  ;;  %v2405_v3 = vadd.f32 %v2379_v49, %v2273_v15 }
 0x2a7   : > { %v2471_v23 = vpop.f32.mrf.mxu1  ;;  %v2534_v41 = vadd.f32 %v2451_v22, %v2402_v2  ;;  %v2406_v6 = vadd.f32 %v2399_v21, %v2274_v13 }
 0x2a8   : > { %v2535_v16 = vadd.f32 %v2471_v23, %v2403_v50 }
 0x2ad   : > { %v2491_v43 = vpop.f32.mrf.mxu2 }
 0x2ae   : > { %v2511_v44 = vpop.f32.mrf.mxu3  ;;  %v2531_v48 = vpop.f32.mrf.mxu0  ;;  %v2536_v18 = vadd.f32 %v2491_v43, %v2404_v53 }
 0x2af   : > { %v2583_v42 = vpop.f32.mrf.mxu1  ;;  %v2537_v19 = vadd.f32 %v2511_v44, %v2405_v3  ;;  %v2538_v20 = vadd.f32 %v2531_v48, %v2406_v6 }
 0x2b0   : > { %v2666_v1 = vadd.f32 %v2583_v42, %v2534_v41 }
 0x2b2   : > { %v2677_v52 = vadd.f32 %v2675_v38, %v2666_v1 }
 0x2b4   : > { %v2687_v12 = vmul.f32 0.1, %v2677_v52 }
 0x2b5   : > { %v2603_v28 = vpop.f32.mrf.mxu2 }
 0x2b6   : > { %v2692_v27 = vadd.f32 %v2687_v12, %v2682_v62  ;;  %v2623_v0 = vpop.f32.mrf.mxu3  ;;  %v2667_v4 = vadd.f32 %v2603_v28, %v2535_v16  ;;  %v2643_v54 = vpop.f32.mrf.mxu0 }
 0x2b7   : > { %v2668_v30 = vadd.f32 %v2623_v0, %v2536_v18  ;;  %v2663_v55 = vpop.f32.mrf.mxu1  ;;  %v2669_v56 = vadd.f32 %v2643_v54, %v2537_v19 }
 0x2b8   : > { %2697 = vst [vmem:[%s3808_s25] sm:$0xff] %v2692_v27  ;;  %v2670_v57 = vadd.f32 %v2663_v55, %v2538_v20  ;;  %v2678_v59 = vadd.f32 %v2675_v38, %v2667_v4 }
 0x2b9   : > { %v2679_v61 = vadd.f32 %v2675_v38, %v2668_v30  ;;  %v2680_v7 = vadd.f32 %v2675_v38, %v2669_v56 }
 0x2ba   : > { %v2681_v9 = vadd.f32 %v2675_v38, %v2670_v57  ;;  %v2688_v10 = vmul.f32 0.1, %v2678_v59 }
 0x2bb   : > { %v2689_v11 = vmul.f32 0.1, %v2679_v61  ;;  %v2690_v49 = vmul.f32 0.1, %v2680_v7 }
 0x2bc   : > { %v2691_v21 = vmul.f32 0.1, %v2681_v9  ;;  %v2693_v22 = vadd.f32 %v2688_v10, %v2683_v63 }
 0x2bd   : > { %v2694_v23 = vadd.f32 %v2689_v11, %v2684_v5  ;;  %v2695_v24 = vadd.f32 %v2690_v49, %v2685_v14 }
 0x2be   : > { %v2696_v25 = vadd.f32 %v2691_v21, %v2686_v17  ;;  %2698 = vst [vmem:[%s3808_s25 + $0x8] sm:$0xff] %v2693_v22 }
 0x2bf   : > { %2699 = vst [vmem:[%s3808_s25 + $0x10] sm:$0xff] %v2694_v23 }
 0x2c0   : > { %2700 = vst [vmem:[%s3808_s25 + $0x18] sm:$0xff] %v2695_v24 }
 0x2c1   : > { %2701 = vst [vmem:[%s3808_s25 + $0x20] sm:$0xff] %v2696_v25 }
 0x2c2 PF: > { %s15_s18 = sadd.s32 1, %s3141_s18  }
 0x2c3   : > { %p12_p4 = scmp.ge.s32.totalorder %s15_s18, 4  }
 0x2c5   :  { %14 = sbr.rel (!%p12_p4) target bundleno = 1 (0x1), region = 86 }

</bundles_post_ra>
